<compile_context>
chip_gen: v7x
topology: tpu7x:2x2x1
jax: 0.10.0
libtpu: 0.0.40
codegen_flags: <defaults>
</compile_context>

<pallas_src>
import functools

import jax
import jax.numpy as jnp
from jax import lax
from jax.experimental import pallas as pl
from jax.experimental.pallas import tpu as pltpu

EPS = 1e-5

TM_CAP = 512          # output-row tile cap (aligned to 16 for bf16 packing)
TN_CAP = 512          # output-channel tile cap (lane-dense, 128-aligned)
TK_CAP = 1024         # reduction tile cap (128-aligned)
VMEM_LIMIT = 32 * 1024 * 1024


def _round_up(x, m):
    return ((x + m - 1) // m) * m


def _tile_and_pad(dim, cap, align):
    """(tile, padded_dim): a full-dim block when the dim fits under `cap`
    (always a legal Mosaic block), otherwise an `align`-aligned cap-sized tile
    with the dim zero-padded up to a multiple (cdiv-style grid)."""
    if dim <= cap:
        return dim, dim
    t = (cap // align) * align
    return t, _round_up(dim, t)


# --------------------------------------------------------------------------
# Kernel 1: tiled matmul + folded BN (+ optional bf16 residual add) (+ ReLU)
#   grid = (M/tm, N/tn, K/tk); f32 VMEM accumulator; init/finalize via pl.when
# --------------------------------------------------------------------------
def _mm_bn_kernel(*refs, relu, fuse_residual):
    if fuse_residual:
        x_ref, w_ref, s_ref, b_ref, r_ref, o_ref, acc_ref = refs
    else:
        x_ref, w_ref, s_ref, b_ref, o_ref, acc_ref = refs

    k = pl.program_id(2)

    @pl.when(k == 0)
    def _():
        acc_ref[...] = jnp.zeros_like(acc_ref)

    acc_ref[...] += jnp.dot(x_ref[...], w_ref[...],
                            preferred_element_type=jnp.float32)

    @pl.when(k == pl.num_programs(2) - 1)
    def _():
        y = acc_ref[...] * s_ref[...] + b_ref[...]
        if fuse_residual:
            y = y + r_ref[...].astype(jnp.float32)   # residual travels as bf16
        if relu:
            y = jnp.maximum(y, 0.0)
        o_ref[...] = y.astype(o_ref.dtype)


def _matmul_bn(x, w, scale, bias, *, relu, residual=None, out_dtype=None):
    """out = [relu]((x @ w) * scale + bias [+ residual]); tiled on the MXU."""
    M, K = x.shape
    K2, N = w.shape
    assert K == K2
    out_dtype = out_dtype if out_dtype is not None else x.dtype

    tm, Mp = _tile_and_pad(M, TM_CAP, 16)
    tn, Np = _tile_and_pad(N, TN_CAP, 128)
    tk, Kp = _tile_and_pad(K, TK_CAP, 128)

    # v7x: keep >= 2 steps on the parallel sub-grid so both TensorCores get work.
    if Mp // tm == 1 and Np // tn == 1 and M >= 32:
        tm = _round_up(-(-M // 2), 16)
        Mp = _round_up(M, tm)

    x_p = jnp.pad(x, ((0, Mp - M), (0, Kp - K))) if (Mp, Kp) != (M, K) else x
    w_p = jnp.pad(w, ((0, Kp - K), (0, Np - N))) if (Kp, Np) != (K, N) else w
    s_p = jnp.pad(scale.reshape(1, -1).astype(jnp.float32), ((0, 0), (0, Np - N)))
    b_p = jnp.pad(bias.reshape(1, -1).astype(jnp.float32), ((0, 0), (0, Np - N)))

    in_specs = [
        pl.BlockSpec((tm, tk), lambda i, j, k: (i, k)),   # x
        pl.BlockSpec((tk, tn), lambda i, j, k: (k, j)),   # w
        pl.BlockSpec((1, tn), lambda i, j, k: (0, j)),    # folded-BN scale
        pl.BlockSpec((1, tn), lambda i, j, k: (0, j)),    # folded-BN bias
    ]
    args = [x_p, w_p, s_p, b_p]
    if residual is not None:
        r_p = (jnp.pad(residual, ((0, Mp - M), (0, Np - N)))
               if (Mp, Np) != (M, N) else residual)
        in_specs.append(pl.BlockSpec((tm, tn), lambda i, j, k: (i, j)))
        args.append(r_p)

    flops = 2 * M * K * N
    bytes_accessed = (M * K * x.dtype.itemsize + K * N * w.dtype.itemsize
                      + M * N * jnp.dtype(out_dtype).itemsize
                      + (M * N * residual.dtype.itemsize if residual is not None else 0))

    out = pl.pallas_call(
        functools.partial(_mm_bn_kernel, relu=relu,
                          fuse_residual=residual is not None),
        out_shape=jax.ShapeDtypeStruct((Mp, Np), out_dtype),
        grid_spec=pltpu.PrefetchScalarGridSpec(
            num_scalar_prefetch=0,
            grid=(Mp // tm, Np // tn, Kp // tk),
            in_specs=in_specs,
            out_specs=pl.BlockSpec((tm, tn), lambda i, j, k: (i, j)),
            scratch_shapes=[pltpu.VMEM((tm, tn), jnp.float32)],
        ),
        compiler_params=pltpu.CompilerParams(
            dimension_semantics=("parallel", "parallel", "arbitrary"),
            vmem_limit_bytes=VMEM_LIMIT,
        ),
        cost_estimate=pl.CostEstimate(flops=flops, transcendentals=0,
                                      bytes_accessed=bytes_accessed),
    )(*args)

    if (Mp, Np) != (M, N):
        out = out[:M, :N]
    return out


# --------------------------------------------------------------------------
# Kernel 2: 3x3 conv + folded BN + ReLU, taps streamed from the padded
# activation (no HBM im2col).  grid = (batch, Cout tiles, Cin tiles).
# --------------------------------------------------------------------------
def _conv3x3_bn_relu_kernel(x_ref, w_ref, s_ref, b_ref, o_ref, acc_ref, *,
                            taps, ho, wo):
    ci = pl.program_id(2)

    @pl.when(ci == 0)
    def _():
        acc_ref[...] = jnp.zeros_like(acc_ref)

    acc = acc_ref[...]
    for t, (pidx, r0, c0) in enumerate(taps):          # static 9-tap unroll
        lhs = x_ref[pidx, 0, r0:r0 + ho, c0:c0 + wo, :].reshape(ho * wo, -1)
        acc = acc + jnp.dot(lhs, w_ref[t], preferred_element_type=jnp.float32)
    acc_ref[...] = acc

    @pl.when(ci == pl.num_programs(2) - 1)
    def _():
        y = acc_ref[...] * s_ref[...] + b_ref[...]
        y = jnp.maximum(y, 0.0)
        o_ref[...] = y.reshape(o_ref.shape).astype(o_ref.dtype)


def conv3x3_bn_relu(x_nhwc, w_oihw, scale, bias, stride, out_dtype):
    N, H, W, Cin = x_nhwc.shape
    Cout = w_oihw.shape[0]
    s = stride
    Ho = (H + 2 - 3) // s + 1
    Wo = (W + 2 - 3) // s + 1
    Wo_p = _round_up(Wo, 8)       # sublane-dense output width; extras sliced off

    # Tap-source planes (P, N, Hs, Ws, Cin) — no HBM im2col.
    #   stride==1: the padded activation itself (P = 1),
    #   stride>1 : s*s parity-subsampled planes (~1x activation bytes total).
    Hs = Ho + 2 // s
    Ws = Wo_p + 2 // s
    xp = jnp.pad(x_nhwc,
                 ((0, 0), (1, s * Hs - (H + 1)), (1, s * Ws - (W + 1)), (0, 0)))
    if s == 1:
        planes = xp[None]
    else:
        planes = jnp.stack([xp[:, pi::s, pj::s, :]
                            for pi in range(s) for pj in range(s)])
    taps = [((ki % s) * s + (kj % s), ki // s, kj // s)
            for ki in range(3) for kj in range(3)]
    P = planes.shape[0]

    # Weights: OIHW -> (kh, kw, Cin, Cout) -> (9, Cin, Cout), tap-major.
    w_col = jnp.transpose(w_oihw, (2, 3, 1, 0)).reshape(9, Cin, Cout)
    w_col = w_col.astype(planes.dtype)

    tci, Cin_p = _tile_and_pad(Cin, TK_CAP, 128)
    tco, Cout_p = _tile_and_pad(Cout, TN_CAP, 128)
    # v7x: keep >= 2 parallel steps when batch == 1 and channels split cleanly.
    if N * (Cout_p // tco) == 1 and (Cout_p // 2) % 128 == 0:
        tco = Cout_p // 2

    if Cin_p != Cin:
        planes = jnp.pad(planes, ((0, 0),) * 4 + ((0, Cin_p - Cin),))
        w_col = jnp.pad(w_col, ((0, 0), (0, Cin_p - Cin), (0, 0)))
    if Cout_p != Cout:
        w_col = jnp.pad(w_col, ((0, 0), (0, 0), (0, Cout_p - Cout)))
    s_p = jnp.pad(scale.reshape(1, -1).astype(jnp.float32),
                  ((0, 0), (0, Cout_p - Cout)))
    b_p = jnp.pad(bias.reshape(1, -1).astype(jnp.float32),
                  ((0, 0), (0, Cout_p - Cout)))

    flops = 2 * N * Ho * Wo * 9 * Cin * Cout
    bytes_accessed = (planes.size * planes.dtype.itemsize
                      + w_col.size * w_col.dtype.itemsize
                      + N * Ho * Wo_p * Cout_p * jnp.dtype(out_dtype).itemsize)

    out = pl.pallas_call(
        functools.partial(_conv3x3_bn_relu_kernel, taps=taps, ho=Ho, wo=Wo_p),
        out_shape=jax.ShapeDtypeStruct((N, Ho, Wo_p, Cout_p), out_dtype),
        grid_spec=pltpu.PrefetchScalarGridSpec(
            num_scalar_prefetch=0,
            grid=(N, Cout_p // tco, Cin_p // tci),
            in_specs=[
                pl.BlockSpec((P, 1, Hs, Ws, tci),
                             lambda n, co, ci: (0, n, 0, 0, ci)),
                pl.BlockSpec((9, tci, tco), lambda n, co, ci: (0, ci, co)),
                pl.BlockSpec((1, tco), lambda n, co, ci: (0, co)),
                pl.BlockSpec((1, tco), lambda n, co, ci: (0, co)),
            ],
            out_specs=pl.BlockSpec((1, Ho, Wo_p, tco),
                                   lambda n, co, ci: (n, 0, 0, co)),
            scratch_shapes=[pltpu.VMEM((Ho * Wo_p, tco), jnp.float32)],
        ),
        compiler_params=pltpu.CompilerParams(
            dimension_semantics=("parallel", "parallel", "arbitrary"),
            vmem_limit_bytes=VMEM_LIMIT,
        ),
        cost_estimate=pl.CostEstimate(flops=flops, transcendentals=0,
                                      bytes_accessed=bytes_accessed),
    )(planes, w_col, s_p, b_p)

    if (Wo_p, Cout_p) != (Wo, Cout):
        out = out[:, :, :Wo, :Cout]
    return out


# --------------------------------------------------------------------------
# Bottleneck forward (Pallas-backed)
# --------------------------------------------------------------------------
def fold_bn(gamma, beta, mean, var):
    scale = gamma / jnp.sqrt(var + EPS)
    bias = beta - mean * scale
    return scale, bias


def bottleneck_forward(x_nchw, p, stride=1, downsampling=False, expansion=4,
                       compute_dtype=jnp.bfloat16):
    # Cast BEFORE the layout transpose so the pure-bandwidth NCHW->NHWC pass
    # moves half the bytes.
    x_c = jnp.transpose(x_nchw.astype(compute_dtype), (0, 2, 3, 1))   # bf16 NHWC
    N, H, W, Cin = x_c.shape
    places = p["w1"].shape[0]
    out_c = places * expansion

    s1, b1 = fold_bn(*p["bn1"])
    s2, b2 = fold_bn(*p["bn2"])
    s3, b3 = fold_bn(*p["bn3"])

    # conv1: 1x1 + BN + ReLU
    w1 = p["w1"][:, :, 0, 0].T.astype(compute_dtype)                  # (Cin, places)
    out = _matmul_bn(x_c.reshape(N * H * W, Cin), w1, s1, b1,
                     relu=True, out_dtype=compute_dtype)
    out = out.reshape(N, H, W, places)

    # conv2: 3x3 stride + pad=1 + BN + ReLU (tap-streamed, no HBM im2col)
    out = conv3x3_bn_relu(out, p["w2"].astype(compute_dtype), s2, b2, stride,
                          out_dtype=compute_dtype)
    _, Ho, Wo, _ = out.shape

    # residual branch (bf16; cast to f32 inside the fused conv3 kernel)
    if downsampling:
        sd, bd = fold_bn(*p["bnd"])
        wd = p["wd"][:, :, 0, 0].T.astype(compute_dtype)              # (Cin, out_c)
        x_sub = x_c[:, ::stride, ::stride, :]
        res = _matmul_bn(x_sub.reshape(N * Ho * Wo, Cin), wd, sd, bd,
                         relu=False, out_dtype=compute_dtype)
    else:
        assert stride == 1 and Cin == out_c, (
            "identity residual requires stride=1 and in_places == places*expansion")
        res = x_c.reshape(N * H * W, Cin)

    # conv3: 1x1 + BN + residual add + ReLU (fully fused, f32 output)
    w3 = p["w3"][:, :, 0, 0].T.astype(compute_dtype)                  # (places, out_c)
    out = _matmul_bn(out.reshape(N * Ho * Wo, places), w3, s3, b3,
                     relu=True, residual=res, out_dtype=jnp.float32)
    out = out.reshape(N, Ho, Wo, out_c)
    return jnp.transpose(out, (0, 3, 1, 2))                           # back to NCHW


# --------------------------------------------------------------------------
# Deterministic parameter init (PyTorch OIHW weight convention)
# --------------------------------------------------------------------------
def init_params(key, in_places, places, expansion, downsampling):
    ks = jax.random.split(key, 8)

    def conv_w(k, o, i, kh, kw):
        fan_in = i * kh * kw
        return jax.random.normal(k, (o, i, kh, kw), jnp.float32) / jnp.sqrt(fan_in)

    def bn_p(k, c):
        k1, k2, k3, k4 = jax.random.split(k, 4)
        gamma = 1.0 + 0.1 * jax.random.normal(k1, (c,), jnp.float32)
        beta = 0.1 * jax.random.normal(k2, (c,), jnp.float32)
        mean = 0.1 * jax.random.normal(k3, (c,), jnp.float32)
        var = jax.random.uniform(k4, (c,), jnp.float32, minval=0.5, maxval=1.5)
        return (gamma, beta, mean, var)

    out_c = places * expansion
    p = {
        "w1": conv_w(ks[0], places, in_places, 1, 1), "bn1": bn_p(ks[1], places),
        "w2": conv_w(ks[2], places, places, 3, 3),    "bn2": bn_p(ks[3], places),
        "w3": conv_w(ks[4], out_c, places, 1, 1),     "bn3": bn_p(ks[5], out_c),
    }
    if downsampling:
        p["wd"] = conv_w(ks[6], out_c, in_places, 1, 1)
        p["bnd"] = bn_p(ks[7], out_c)
    return p


# --------------------------------------------------------------------------
# Pure-JAX reference (lax.conv, f32) for correctness check
# --------------------------------------------------------------------------
def ref_forward(x, p, stride, downsampling):
    def conv(x, w, s, pad):
        return lax.conv_general_dilated(
            x, w, (s, s), [(pad, pad), (pad, pad)],
            dimension_numbers=("NCHW", "OIHW", "NCHW"))

    def bn(x, g, b, m, v):
        sh = (1, -1, 1, 1)
        return (x - m.reshape(sh)) / jnp.sqrt(v.reshape(sh) + EPS) * g.reshape(sh) + b.reshape(sh)

    out = jax.nn.relu(bn(conv(x, p["w1"], 1, 0), *p["bn1"]))
    out = jax.nn.relu(bn(conv(out, p["w2"], stride, 1), *p["bn2"]))
    out = bn(conv(out, p["w3"], 1, 0), *p["bn3"])
    res = x
    if downsampling:
        res = bn(conv(x, p["wd"], stride, 0), *p["bnd"])
    return jax.nn.relu(out + res)


if __name__ == "__main__":
    key = jax.random.PRNGKey(0)
    k_p1, k_x1, k_p2, k_x2 = jax.random.split(key, 4)

    # Tolerance accounts for bf16 MXU inputs / bf16 residual vs the f32 reference.
    ATOL = RTOL = 5e-2

    # Case 1: identity residual (in_places == places*expansion, stride=1)
    in_places, places, expansion = 16, 4, 4
    p1 = init_params(k_p1, in_places, places, expansion, downsampling=False)
    x1 = jax.random.normal(k_x1, (2, in_places, 8, 8), jnp.float32)
    fwd1 = jax.jit(lambda x, p: bottleneck_forward(x, p, stride=1, downsampling=False))
    y1 = jax.block_until_ready(fwd1(x1, p1))
    r1 = ref_forward(x1, p1, 1, False)
    assert y1.shape == r1.shape
    assert jnp.allclose(y1, r1, atol=ATOL, rtol=RTOL), float(jnp.max(jnp.abs(y1 - r1)))

    # Case 2: downsampling residual branch (stride=2)
    p2 = init_params(k_p2, 8, places, expansion, downsampling=True)
    x2 = jax.random.normal(k_x2, (2, 8, 8, 8), jnp.float32)
    fwd2 = jax.jit(lambda x, p: bottleneck_forward(x, p, stride=2, downsampling=True))
    y2 = jax.block_until_ready(fwd2(x2, p2))
    r2 = ref_forward(x2, p2, 2, True)
    assert y2.shape == r2.shape
    assert jnp.allclose(y2, r2, atol=ATOL, rtol=RTOL), float(jnp.max(jnp.abs(y2 - r2)))

    print("KERNEL_OK")
</pallas_src>

<mosaic_0001>
module attributes {stable_mosaic.version = 11 : i64} {
  func.func @_conv3x3_bn_relu_kernel(%arg0: i32, %arg1: i32, %arg2: i32, %arg3: memref<1x1x10x10x4xbf16, #tpu.memory_space<vmem>>, %arg4: memref<9x4x4xbf16, #tpu.memory_space<vmem>>, %arg5: memref<1x4xf32, #tpu.memory_space<vmem>>, %arg6: memref<1x4xf32, #tpu.memory_space<vmem>>, %arg7: memref<1x8x8x4xbf16, #tpu.memory_space<vmem>>, %arg8: memref<64x4xf32, #tpu.memory_space<vmem>>) attributes {dimension_semantics = [#tpu.dimension_semantics<parallel>, #tpu.dimension_semantics<parallel>, #tpu.dimension_semantics<arbitrary>], iteration_bounds = array<i64: 2, 1, 1>, scalar_prefetch = 0 : i64, scratch_operands = 1 : i64, tpu.core_type = #tpu.core_type<tc>, window_params = [{transform_indices = @transform_0, window_bounds = array<i64: 1, 1, 10, 10, 4>}, {transform_indices = @transform_1, window_bounds = array<i64: 9, 4, 4>}, {transform_indices = @transform_2, window_bounds = array<i64: 1, 4>}, {transform_indices = @transform_3, window_bounds = array<i64: 1, 4>}, {transform_indices = @transform_4, window_bounds = array<i64: 1, 8, 8, 4>}]} {
    %c0_i32 = arith.constant 0 : i32
    %0 = arith.cmpi eq, %arg2, %c0_i32 : i32
    %1 = arith.extui %0 : i1 to i32
    %c0_i32_0 = arith.constant 0 : i32
    %2 = arith.cmpi ne, %1, %c0_i32_0 : i32
    scf.if %2 {
      %cst_78 = arith.constant 0.000000e+00 : f32
      %71 = vector.broadcast %cst_78 : f32 to vector<64x4xf32>
      %c0_79 = arith.constant 0 : index
      %c0_80 = arith.constant 0 : index
      %72 = vector.load %arg8[%c0_79, %c0_80] : memref<64x4xf32, #tpu.memory_space<vmem>>, vector<64x4xf32>
      tpu.vector_store %arg8[%c0_79, %c0_80], %71 {strides = array<i32>} : memref<64x4xf32, #tpu.memory_space<vmem>>, vector<64x4xf32>,
    } else {
    }
    %c0 = arith.constant 0 : index
    %c0_1 = arith.constant 0 : index
    %3 = vector.load %arg8[%c0, %c0_1] : memref<64x4xf32, #tpu.memory_space<vmem>>, vector<64x4xf32>
    %c0_2 = arith.constant 0 : index
    %c0_3 = arith.constant 0 : index
    %c0_4 = arith.constant 0 : index
    %c0_5 = arith.constant 0 : index
    %c0_6 = arith.constant 0 : index
    %4 = vector.load %arg3[%c0_2, %c0_3, %c0_4, %c0_5, %c0_6] : memref<1x1x10x10x4xbf16, #tpu.memory_space<vmem>>, vector<1x1x8x8x4xbf16>
    %5 = vector.shape_cast %4 : vector<1x1x8x8x4xbf16> to vector<8x8x4xbf16>
    %6 = vector.shape_cast %5 : vector<8x8x4xbf16> to vector<64x4xbf16>
    %c0_7 = arith.constant 0 : index
    %c0_8 = arith.constant 0 : index
    %c0_9 = arith.constant 0 : index
    %7 = vector.load %arg4[%c0_7, %c0_8, %c0_9] : memref<9x4x4xbf16, #tpu.memory_space<vmem>>, vector<1x4x4xbf16>
    %8 = vector.shape_cast %7 : vector<1x4x4xbf16> to vector<4x4xbf16>
    %cst = arith.constant dense<0.000000e+00> : vector<64x4xf32>
    %9 = tpu.matmul %6, %8, %cst {dimension_numbers = #tpu.dot_dimension_numbers<[1], [0], [0], [1], [0, 0, 1, 1], [], []>} : vector<64x4xbf16>, vector<4x4xbf16>, vector<64x4xf32> -> vector<64x4xf32>
    %10 = arith.addf %3, %9 : vector<64x4xf32>
    %c0_10 = arith.constant 0 : index
    %c0_11 = arith.constant 0 : index
    %c0_12 = arith.constant 0 : index
    %c1 = arith.constant 1 : index
    %c0_13 = arith.constant 0 : index
    %11 = vector.load %arg3[%c0_10, %c0_11, %c0_12, %c1, %c0_13] : memref<1x1x10x10x4xbf16, #tpu.memory_space<vmem>>, vector<1x1x8x8x4xbf16>
    %12 = vector.shape_cast %11 : vector<1x1x8x8x4xbf16> to vector<8x8x4xbf16>
    %13 = vector.shape_cast %12 : vector<8x8x4xbf16> to vector<64x4xbf16>
    %c1_14 = arith.constant 1 : index
    %c0_15 = arith.constant 0 : index
    %c0_16 = arith.constant 0 : index
    %14 = vector.load %arg4[%c1_14, %c0_15, %c0_16] : memref<9x4x4xbf16, #tpu.memory_space<vmem>>, vector<1x4x4xbf16>
    %15 = vector.shape_cast %14 : vector<1x4x4xbf16> to vector<4x4xbf16>
    %cst_17 = arith.constant dense<0.000000e+00> : vector<64x4xf32>
    %16 = tpu.matmul %13, %15, %cst_17 {dimension_numbers = #tpu.dot_dimension_numbers<[1], [0], [0], [1], [0, 0, 1, 1], [], []>} : vector<64x4xbf16>, vector<4x4xbf16>, vector<64x4xf32> -> vector<64x4xf32>
    %17 = arith.addf %10, %16 : vector<64x4xf32>
    %c0_18 = arith.constant 0 : index
    %c0_19 = arith.constant 0 : index
    %c0_20 = arith.constant 0 : index
    %c2 = arith.constant 2 : index
    %c0_21 = arith.constant 0 : index
    %18 = vector.load %arg3[%c0_18, %c0_19, %c0_20, %c2, %c0_21] : memref<1x1x10x10x4xbf16, #tpu.memory_space<vmem>>, vector<1x1x8x8x4xbf16>
    %19 = vector.shape_cast %18 : vector<1x1x8x8x4xbf16> to vector<8x8x4xbf16>
    %20 = vector.shape_cast %19 : vector<8x8x4xbf16> to vector<64x4xbf16>
    %c2_22 = arith.constant 2 : index
    %c0_23 = arith.constant 0 : index
    %c0_24 = arith.constant 0 : index
    %21 = vector.load %arg4[%c2_22, %c0_23, %c0_24] : memref<9x4x4xbf16, #tpu.memory_space<vmem>>, vector<1x4x4xbf16>
    %22 = vector.shape_cast %21 : vector<1x4x4xbf16> to vector<4x4xbf16>
    %cst_25 = arith.constant dense<0.000000e+00> : vector<64x4xf32>
    %23 = tpu.matmul %20, %22, %cst_25 {dimension_numbers = #tpu.dot_dimension_numbers<[1], [0], [0], [1], [0, 0, 1, 1], [], []>} : vector<64x4xbf16>, vector<4x4xbf16>, vector<64x4xf32> -> vector<64x4xf32>
    %24 = arith.addf %17, %23 : vector<64x4xf32>
    %c0_26 = arith.constant 0 : index
    %c0_27 = arith.constant 0 : index
    %c1_28 = arith.constant 1 : index
    %c0_29 = arith.constant 0 : index
    %c0_30 = arith.constant 0 : index
    %25 = vector.load %arg3[%c0_26, %c0_27, %c1_28, %c0_29, %c0_30] : memref<1x1x10x10x4xbf16, #tpu.memory_space<vmem>>, vector<1x1x8x8x4xbf16>
    %26 = vector.shape_cast %25 : vector<1x1x8x8x4xbf16> to vector<8x8x4xbf16>
    %27 = vector.shape_cast %26 : vector<8x8x4xbf16> to vector<64x4xbf16>
    %c3 = arith.constant 3 : index
    %c0_31 = arith.constant 0 : index
    %c0_32 = arith.constant 0 : index
    %28 = vector.load %arg4[%c3, %c0_31, %c0_32] : memref<9x4x4xbf16, #tpu.memory_space<vmem>>, vector<1x4x4xbf16>
    %29 = vector.shape_cast %28 : vector<1x4x4xbf16> to vector<4x4xbf16>
    %cst_33 = arith.constant dense<0.000000e+00> : vector<64x4xf32>
    %30 = tpu.matmul %27, %29, %cst_33 {dimension_numbers = #tpu.dot_dimension_numbers<[1], [0], [0], [1], [0, 0, 1, 1], [], []>} : vector<64x4xbf16>, vector<4x4xbf16>, vector<64x4xf32> -> vector<64x4xf32>
    %31 = arith.addf %24, %30 : vector<64x4xf32>
    %c0_34 = arith.constant 0 : index
    %c0_35 = arith.constant 0 : index
    %c1_36 = arith.constant 1 : index
    %c1_37 = arith.constant 1 : index
    %c0_38 = arith.constant 0 : index
    %32 = vector.load %arg3[%c0_34, %c0_35, %c1_36, %c1_37, %c0_38] : memref<1x1x10x10x4xbf16, #tpu.memory_space<vmem>>, vector<1x1x8x8x4xbf16>
    %33 = vector.shape_cast %32 : vector<1x1x8x8x4xbf16> to vector<8x8x4xbf16>
    %34 = vector.shape_cast %33 : vector<8x8x4xbf16> to vector<64x4xbf16>
    %c4 = arith.constant 4 : index
    %c0_39 = arith.constant 0 : index
    %c0_40 = arith.constant 0 : index
    %35 = vector.load %arg4[%c4, %c0_39, %c0_40] : memref<9x4x4xbf16, #tpu.memory_space<vmem>>, vector<1x4x4xbf16>
    %36 = vector.shape_cast %35 : vector<1x4x4xbf16> to vector<4x4xbf16>
    %cst_41 = arith.constant dense<0.000000e+00> : vector<64x4xf32>
    %37 = tpu.matmul %34, %36, %cst_41 {dimension_numbers = #tpu.dot_dimension_numbers<[1], [0], [0], [1], [0, 0, 1, 1], [], []>} : vector<64x4xbf16>, vector<4x4xbf16>, vector<64x4xf32> -> vector<64x4xf32>
    %38 = arith.addf %31, %37 : vector<64x4xf32>
    %c0_42 = arith.constant 0 : index
    %c0_43 = arith.constant 0 : index
    %c1_44 = arith.constant 1 : index
    %c2_45 = arith.constant 2 : index
    %c0_46 = arith.constant 0 : index
    %39 = vector.load %arg3[%c0_42, %c0_43, %c1_44, %c2_45, %c0_46] : memref<1x1x10x10x4xbf16, #tpu.memory_space<vmem>>, vector<1x1x8x8x4xbf16>
    %40 = vector.shape_cast %39 : vector<1x1x8x8x4xbf16> to vector<8x8x4xbf16>
    %41 = vector.shape_cast %40 : vector<8x8x4xbf16> to vector<64x4xbf16>
    %c5 = arith.constant 5 : index
    %c0_47 = arith.constant 0 : index
    %c0_48 = arith.constant 0 : index
    %42 = vector.load %arg4[%c5, %c0_47, %c0_48] : memref<9x4x4xbf16, #tpu.memory_space<vmem>>, vector<1x4x4xbf16>
    %43 = vector.shape_cast %42 : vector<1x4x4xbf16> to vector<4x4xbf16>
    %cst_49 = arith.constant dense<0.000000e+00> : vector<64x4xf32>
    %44 = tpu.matmul %41, %43, %cst_49 {dimension_numbers = #tpu.dot_dimension_numbers<[1], [0], [0], [1], [0, 0, 1, 1], [], []>} : vector<64x4xbf16>, vector<4x4xbf16>, vector<64x4xf32> -> vector<64x4xf32>
    %45 = arith.addf %38, %44 : vector<64x4xf32>
    %c0_50 = arith.constant 0 : index
    %c0_51 = arith.constant 0 : index
    %c2_52 = arith.constant 2 : index
    %c0_53 = arith.constant 0 : index
    %c0_54 = arith.constant 0 : index
    %46 = vector.load %arg3[%c0_50, %c0_51, %c2_52, %c0_53, %c0_54] : memref<1x1x10x10x4xbf16, #tpu.memory_space<vmem>>, vector<1x1x8x8x4xbf16>
    %47 = vector.shape_cast %46 : vector<1x1x8x8x4xbf16> to vector<8x8x4xbf16>
    %48 = vector.shape_cast %47 : vector<8x8x4xbf16> to vector<64x4xbf16>
    %c6 = arith.constant 6 : index
    %c0_55 = arith.constant 0 : index
    %c0_56 = arith.constant 0 : index
    %49 = vector.load %arg4[%c6, %c0_55, %c0_56] : memref<9x4x4xbf16, #tpu.memory_space<vmem>>, vector<1x4x4xbf16>
    %50 = vector.shape_cast %49 : vector<1x4x4xbf16> to vector<4x4xbf16>
    %cst_57 = arith.constant dense<0.000000e+00> : vector<64x4xf32>
    %51 = tpu.matmul %48, %50, %cst_57 {dimension_numbers = #tpu.dot_dimension_numbers<[1], [0], [0], [1], [0, 0, 1, 1], [], []>} : vector<64x4xbf16>, vector<4x4xbf16>, vector<64x4xf32> -> vector<64x4xf32>
    %52 = arith.addf %45, %51 : vector<64x4xf32>
    %c0_58 = arith.constant 0 : index
    %c0_59 = arith.constant 0 : index
    %c2_60 = arith.constant 2 : index
    %c1_61 = arith.constant 1 : index
    %c0_62 = arith.constant 0 : index
    %53 = vector.load %arg3[%c0_58, %c0_59, %c2_60, %c1_61, %c0_62] : memref<1x1x10x10x4xbf16, #tpu.memory_space<vmem>>, vector<1x1x8x8x4xbf16>
    %54 = vector.shape_cast %53 : vector<1x1x8x8x4xbf16> to vector<8x8x4xbf16>
    %55 = vector.shape_cast %54 : vector<8x8x4xbf16> to vector<64x4xbf16>
    %c7 = arith.constant 7 : index
    %c0_63 = arith.constant 0 : index
    %c0_64 = arith.constant 0 : index
    %56 = vector.load %arg4[%c7, %c0_63, %c0_64] : memref<9x4x4xbf16, #tpu.memory_space<vmem>>, vector<1x4x4xbf16>
    %57 = vector.shape_cast %56 : vector<1x4x4xbf16> to vector<4x4xbf16>
    %cst_65 = arith.constant dense<0.000000e+00> : vector<64x4xf32>
    %58 = tpu.matmul %55, %57, %cst_65 {dimension_numbers = #tpu.dot_dimension_numbers<[1], [0], [0], [1], [0, 0, 1, 1], [], []>} : vector<64x4xbf16>, vector<4x4xbf16>, vector<64x4xf32> -> vector<64x4xf32>
    %59 = arith.addf %52, %58 : vector<64x4xf32>
    %c0_66 = arith.constant 0 : index
    %c0_67 = arith.constant 0 : index
    %c2_68 = arith.constant 2 : index
    %c2_69 = arith.constant 2 : index
    %c0_70 = arith.constant 0 : index
    %60 = vector.load %arg3[%c0_66, %c0_67, %c2_68, %c2_69, %c0_70] : memref<1x1x10x10x4xbf16, #tpu.memory_space<vmem>>, vector<1x1x8x8x4xbf16>
    %61 = vector.shape_cast %60 : vector<1x1x8x8x4xbf16> to vector<8x8x4xbf16>
    %62 = vector.shape_cast %61 : vector<8x8x4xbf16> to vector<64x4xbf16>
    %c8 = arith.constant 8 : index
    %c0_71 = arith.constant 0 : index
    %c0_72 = arith.constant 0 : index
    %63 = vector.load %arg4[%c8, %c0_71, %c0_72] : memref<9x4x4xbf16, #tpu.memory_space<vmem>>, vector<1x4x4xbf16>
    %64 = vector.shape_cast %63 : vector<1x4x4xbf16> to vector<4x4xbf16>
    %cst_73 = arith.constant dense<0.000000e+00> : vector<64x4xf32>
    %65 = tpu.matmul %62, %64, %cst_73 {dimension_numbers = #tpu.dot_dimension_numbers<[1], [0], [0], [1], [0, 0, 1, 1], [], []>} : vector<64x4xbf16>, vector<4x4xbf16>, vector<64x4xf32> -> vector<64x4xf32>
    %66 = arith.addf %59, %65 : vector<64x4xf32>
    %c0_74 = arith.constant 0 : index
    %c0_75 = arith.constant 0 : index
    %67 = vector.load %arg8[%c0_74, %c0_75] : memref<64x4xf32, #tpu.memory_space<vmem>>, vector<64x4xf32>
    tpu.vector_store %arg8[%c0_74, %c0_75], %66 {strides = array<i32>} : memref<64x4xf32, #tpu.memory_space<vmem>>, vector<64x4xf32>,
    %c0_i32_76 = arith.constant 0 : i32
    %68 = arith.cmpi eq, %arg2, %c0_i32_76 : i32
    %69 = arith.extui %68 : i1 to i32
    %c0_i32_77 = arith.constant 0 : i32
    %70 = arith.cmpi ne, %69, %c0_i32_77 : i32
    scf.if %70 {
      %c0_78 = arith.constant 0 : index
      %c0_79 = arith.constant 0 : index
      %71 = vector.load %arg8[%c0_78, %c0_79] : memref<64x4xf32, #tpu.memory_space<vmem>>, vector<64x4xf32>
      %c0_80 = arith.constant 0 : index
      %c0_81 = arith.constant 0 : index
      %72 = vector.load %arg5[%c0_80, %c0_81] : memref<1x4xf32, #tpu.memory_space<vmem>>, vector<1x4xf32>
      %73 = vector.broadcast %72 : vector<1x4xf32> to vector<64x4xf32>
      %74 = arith.mulf %71, %73 : vector<64x4xf32>
      %c0_82 = arith.constant 0 : index
      %c0_83 = arith.constant 0 : index
      %75 = vector.load %arg6[%c0_82, %c0_83] : memref<1x4xf32, #tpu.memory_space<vmem>>, vector<1x4xf32>
      %76 = vector.broadcast %75 : vector<1x4xf32> to vector<64x4xf32>
      %77 = arith.addf %74, %76 : vector<64x4xf32>
      %cst_84 = arith.constant 0.000000e+00 : f32
      %78 = vector.broadcast %cst_84 : f32 to vector<64x4xf32>
      %79 = arith.maximumf %77, %78 : vector<64x4xf32>
      %80 = vector.shape_cast %79 : vector<64x4xf32> to vector<1x8x8x4xf32>
      %81 = arith.truncf %80 : vector<1x8x8x4xf32> to vector<1x8x8x4xbf16>
      %c0_85 = arith.constant 0 : index
      %c0_86 = arith.constant 0 : index
      %c0_87 = arith.constant 0 : index
      %c0_88 = arith.constant 0 : index
      %82 = vector.load %arg7[%c0_85, %c0_86, %c0_87, %c0_88] : memref<1x8x8x4xbf16, #tpu.memory_space<vmem>>, vector<1x8x8x4xbf16>
      tpu.vector_store %arg7[%c0_85, %c0_86, %c0_87, %c0_88], %81 {strides = array<i32>} : memref<1x8x8x4xbf16, #tpu.memory_space<vmem>>, vector<1x8x8x4xbf16>,
    } else {
    }
    return
  }
  func.func @transform_0(%arg0: i32, %arg1: i32, %arg2: i32) -> (i32, i32, i32, i32, i32) {
    %c0_i32 = arith.constant 0 : i32
    %c0_i32_0 = arith.constant 0 : i32
    %c0_i32_1 = arith.constant 0 : i32
    %c0_i32_2 = arith.constant 0 : i32
    return %c0_i32, %arg0, %c0_i32_0, %c0_i32_1, %arg2 : i32, i32, i32, i32, i32
  }
  func.func @transform_1(%arg0: i32, %arg1: i32, %arg2: i32) -> (i32, i32, i32) {
    %c0_i32 = arith.constant 0 : i32
    %c0_i32_0 = arith.constant 0 : i32
    return %c0_i32, %arg2, %arg1 : i32, i32, i32
  }
  func.func @transform_2(%arg0: i32, %arg1: i32, %arg2: i32) -> (i32, i32) {
    %c0_i32 = arith.constant 0 : i32
    %c0_i32_0 = arith.constant 0 : i32
    return %c0_i32, %arg1 : i32, i32
  }
  func.func @transform_3(%arg0: i32, %arg1: i32, %arg2: i32) -> (i32, i32) {
    %c0_i32 = arith.constant 0 : i32
    %c0_i32_0 = arith.constant 0 : i32
    return %c0_i32, %arg1 : i32, i32
  }
  func.func @transform_4(%arg0: i32, %arg1: i32, %arg2: i32) -> (i32, i32, i32, i32) {
    %c0_i32 = arith.constant 0 : i32
    %c0_i32_0 = arith.constant 0 : i32
    %c0_i32_1 = arith.constant 0 : i32
    return %arg0, %c0_i32, %c0_i32_0, %arg1 : i32, i32, i32, i32
  }
}

module attributes {stable_mosaic.version = 11 : i64} {
  func.func @_mm_bn_kernel(%arg0: i32, %arg1: i32, %arg2: i32, %arg3: memref<64x16xbf16, #tpu.memory_space<vmem>>, %arg4: memref<16x4xbf16, #tpu.memory_space<vmem>>, %arg5: memref<1x4xf32, #tpu.memory_space<vmem>>, %arg6: memref<1x4xf32, #tpu.memory_space<vmem>>, %arg7: memref<64x4xbf16, #tpu.memory_space<vmem>>, %arg8: memref<64x4xf32, #tpu.memory_space<vmem>>) attributes {dimension_semantics = [#tpu.dimension_semantics<parallel>, #tpu.dimension_semantics<parallel>, #tpu.dimension_semantics<arbitrary>], iteration_bounds = array<i64: 2, 1, 1>, scalar_prefetch = 0 : i64, scratch_operands = 1 : i64, tpu.core_type = #tpu.core_type<tc>, window_params = [{transform_indices = @transform_0, window_bounds = array<i64: 64, 16>}, {transform_indices = @transform_1, window_bounds = array<i64: 16, 4>}, {transform_indices = @transform_2, window_bounds = array<i64: 1, 4>}, {transform_indices = @transform_3, window_bounds = array<i64: 1, 4>}, {transform_indices = @transform_4, window_bounds = array<i64: 64, 4>}]} {
    %c0_i32 = arith.constant 0 : i32
    %0 = arith.cmpi eq, %arg2, %c0_i32 : i32
    %1 = arith.extui %0 : i1 to i32
    %c0_i32_0 = arith.constant 0 : i32
    %2 = arith.cmpi ne, %1, %c0_i32_0 : i32
    scf.if %2 {
      %cst_10 = arith.constant 0.000000e+00 : f32
      %12 = vector.broadcast %cst_10 : f32 to vector<64x4xf32>
      %c0_11 = arith.constant 0 : index
      %c0_12 = arith.constant 0 : index
      %13 = vector.load %arg8[%c0_11, %c0_12] : memref<64x4xf32, #tpu.memory_space<vmem>>, vector<64x4xf32>
      tpu.vector_store %arg8[%c0_11, %c0_12], %12 {strides = array<i32>} : memref<64x4xf32, #tpu.memory_space<vmem>>, vector<64x4xf32>,
    } else {
    }
    %c0 = arith.constant 0 : index
    %c0_1 = arith.constant 0 : index
    %3 = vector.load %arg8[%c0, %c0_1] : memref<64x4xf32, #tpu.memory_space<vmem>>, vector<64x4xf32>
    %c0_2 = arith.constant 0 : index
    %c0_3 = arith.constant 0 : index
    %4 = vector.load %arg3[%c0_2, %c0_3] : memref<64x16xbf16, #tpu.memory_space<vmem>>, vector<64x16xbf16>
    %c0_4 = arith.constant 0 : index
    %c0_5 = arith.constant 0 : index
    %5 = vector.load %arg4[%c0_4, %c0_5] : memref<16x4xbf16, #tpu.memory_space<vmem>>, vector<16x4xbf16>
    %cst = arith.constant dense<0.000000e+00> : vector<64x4xf32>
    %6 = tpu.matmul %4, %5, %cst {dimension_numbers = #tpu.dot_dimension_numbers<[1], [0], [0], [1], [0, 0, 1, 1], [], []>} : vector<64x16xbf16>, vector<16x4xbf16>, vector<64x4xf32> -> vector<64x4xf32>
    %7 = arith.addf %3, %6 : vector<64x4xf32>
    %c0_6 = arith.constant 0 : index
    %c0_7 = arith.constant 0 : index
    %8 = vector.load %arg8[%c0_6, %c0_7] : memref<64x4xf32, #tpu.memory_space<vmem>>, vector<64x4xf32>
    tpu.vector_store %arg8[%c0_6, %c0_7], %7 {strides = array<i32>} : memref<64x4xf32, #tpu.memory_space<vmem>>, vector<64x4xf32>,
    %c0_i32_8 = arith.constant 0 : i32
    %9 = arith.cmpi eq, %arg2, %c0_i32_8 : i32
    %10 = arith.extui %9 : i1 to i32
    %c0_i32_9 = arith.constant 0 : i32
    %11 = arith.cmpi ne, %10, %c0_i32_9 : i32
    scf.if %11 {
      %c0_10 = arith.constant 0 : index
      %c0_11 = arith.constant 0 : index
      %12 = vector.load %arg8[%c0_10, %c0_11] : memref<64x4xf32, #tpu.memory_space<vmem>>, vector<64x4xf32>
      %c0_12 = arith.constant 0 : index
      %c0_13 = arith.constant 0 : index
      %13 = vector.load %arg5[%c0_12, %c0_13] : memref<1x4xf32, #tpu.memory_space<vmem>>, vector<1x4xf32>
      %14 = vector.broadcast %13 : vector<1x4xf32> to vector<64x4xf32>
      %15 = arith.mulf %12, %14 : vector<64x4xf32>
      %c0_14 = arith.constant 0 : index
      %c0_15 = arith.constant 0 : index
      %16 = vector.load %arg6[%c0_14, %c0_15] : memref<1x4xf32, #tpu.memory_space<vmem>>, vector<1x4xf32>
      %17 = vector.broadcast %16 : vector<1x4xf32> to vector<64x4xf32>
      %18 = arith.addf %15, %17 : vector<64x4xf32>
      %cst_16 = arith.constant 0.000000e+00 : f32
      %19 = vector.broadcast %cst_16 : f32 to vector<64x4xf32>
      %20 = arith.maximumf %18, %19 : vector<64x4xf32>
      %21 = arith.truncf %20 : vector<64x4xf32> to vector<64x4xbf16>
      %c0_17 = arith.constant 0 : index
      %c0_18 = arith.constant 0 : index
      %22 = vector.load %arg7[%c0_17, %c0_18] : memref<64x4xbf16, #tpu.memory_space<vmem>>, vector<64x4xbf16>
      tpu.vector_store %arg7[%c0_17, %c0_18], %21 {strides = array<i32>} : memref<64x4xbf16, #tpu.memory_space<vmem>>, vector<64x4xbf16>,
    } else {
    }
    return
  }
  func.func @transform_0(%arg0: i32, %arg1: i32, %arg2: i32) -> (i32, i32) {
    %c0_i32 = arith.constant 0 : i32
    return %arg0, %arg2 : i32, i32
  }
  func.func @transform_1(%arg0: i32, %arg1: i32, %arg2: i32) -> (i32, i32) {
    %c0_i32 = arith.constant 0 : i32
    return %arg2, %arg1 : i32, i32
  }
  func.func @transform_2(%arg0: i32, %arg1: i32, %arg2: i32) -> (i32, i32) {
    %c0_i32 = arith.constant 0 : i32
    %c0_i32_0 = arith.constant 0 : i32
    return %c0_i32, %arg1 : i32, i32
  }
  func.func @transform_3(%arg0: i32, %arg1: i32, %arg2: i32) -> (i32, i32) {
    %c0_i32 = arith.constant 0 : i32
    %c0_i32_0 = arith.constant 0 : i32
    return %c0_i32, %arg1 : i32, i32
  }
  func.func @transform_4(%arg0: i32, %arg1: i32, %arg2: i32) -> (i32, i32) {
    %c0_i32 = arith.constant 0 : i32
    return %arg0, %arg1 : i32, i32
  }
}

module attributes {stable_mosaic.version = 11 : i64} {
  func.func @_mm_bn_kernel(%arg0: i32, %arg1: i32, %arg2: i32, %arg3: memref<64x4xbf16, #tpu.memory_space<vmem>>, %arg4: memref<4x16xbf16, #tpu.memory_space<vmem>>, %arg5: memref<1x16xf32, #tpu.memory_space<vmem>>, %arg6: memref<1x16xf32, #tpu.memory_space<vmem>>, %arg7: memref<64x16xbf16, #tpu.memory_space<vmem>>, %arg8: memref<64x16xf32, #tpu.memory_space<vmem>>, %arg9: memref<64x16xf32, #tpu.memory_space<vmem>>) attributes {dimension_semantics = [#tpu.dimension_semantics<parallel>, #tpu.dimension_semantics<parallel>, #tpu.dimension_semantics<arbitrary>], iteration_bounds = array<i64: 2, 1, 1>, scalar_prefetch = 0 : i64, scratch_operands = 1 : i64, tpu.core_type = #tpu.core_type<tc>, window_params = [{transform_indices = @transform_0, window_bounds = array<i64: 64, 4>}, {transform_indices = @transform_1, window_bounds = array<i64: 4, 16>}, {transform_indices = @transform_2, window_bounds = array<i64: 1, 16>}, {transform_indices = @transform_3, window_bounds = array<i64: 1, 16>}, {transform_indices = @transform_4, window_bounds = array<i64: 64, 16>}, {transform_indices = @transform_5, window_bounds = array<i64: 64, 16>}]} {
    %c0_i32 = arith.constant 0 : i32
    %0 = arith.cmpi eq, %arg2, %c0_i32 : i32
    %1 = arith.extui %0 : i1 to i32
    %c0_i32_0 = arith.constant 0 : i32
    %2 = arith.cmpi ne, %1, %c0_i32_0 : i32
    scf.if %2 {
      %cst_10 = arith.constant 0.000000e+00 : f32
      %12 = vector.broadcast %cst_10 : f32 to vector<64x16xf32>
      %c0_11 = arith.constant 0 : index
      %c0_12 = arith.constant 0 : index
      %13 = vector.load %arg9[%c0_11, %c0_12] : memref<64x16xf32, #tpu.memory_space<vmem>>, vector<64x16xf32>
      tpu.vector_store %arg9[%c0_11, %c0_12], %12 {strides = array<i32>} : memref<64x16xf32, #tpu.memory_space<vmem>>, vector<64x16xf32>,
    } else {
    }
    %c0 = arith.constant 0 : index
    %c0_1 = arith.constant 0 : index
    %3 = vector.load %arg9[%c0, %c0_1] : memref<64x16xf32, #tpu.memory_space<vmem>>, vector<64x16xf32>
    %c0_2 = arith.constant 0 : index
    %c0_3 = arith.constant 0 : index
    %4 = vector.load %arg3[%c0_2, %c0_3] : memref<64x4xbf16, #tpu.memory_space<vmem>>, vector<64x4xbf16>
    %c0_4 = arith.constant 0 : index
    %c0_5 = arith.constant 0 : index
    %5 = vector.load %arg4[%c0_4, %c0_5] : memref<4x16xbf16, #tpu.memory_space<vmem>>, vector<4x16xbf16>
    %cst = arith.constant dense<0.000000e+00> : vector<64x16xf32>
    %6 = tpu.matmul %4, %5, %cst {dimension_numbers = #tpu.dot_dimension_numbers<[1], [0], [0], [1], [0, 0, 1, 1], [], []>} : vector<64x4xbf16>, vector<4x16xbf16>, vector<64x16xf32> -> vector<64x16xf32>
    %7 = arith.addf %3, %6 : vector<64x16xf32>
    %c0_6 = arith.constant 0 : index
    %c0_7 = arith.constant 0 : index
    %8 = vector.load %arg9[%c0_6, %c0_7] : memref<64x16xf32, #tpu.memory_space<vmem>>, vector<64x16xf32>
    tpu.vector_store %arg9[%c0_6, %c0_7], %7 {strides = array<i32>} : memref<64x16xf32, #tpu.memory_space<vmem>>, vector<64x16xf32>,
    %c0_i32_8 = arith.constant 0 : i32
    %9 = arith.cmpi eq, %arg2, %c0_i32_8 : i32
    %10 = arith.extui %9 : i1 to i32
    %c0_i32_9 = arith.constant 0 : i32
    %11 = arith.cmpi ne, %10, %c0_i32_9 : i32
    scf.if %11 {
      %c0_10 = arith.constant 0 : index
      %c0_11 = arith.constant 0 : index
      %12 = vector.load %arg9[%c0_10, %c0_11] : memref<64x16xf32, #tpu.memory_space<vmem>>, vector<64x16xf32>
      %c0_12 = arith.constant 0 : index
      %c0_13 = arith.constant 0 : index
      %13 = vector.load %arg5[%c0_12, %c0_13] : memref<1x16xf32, #tpu.memory_space<vmem>>, vector<1x16xf32>
      %14 = vector.broadcast %13 : vector<1x16xf32> to vector<64x16xf32>
      %15 = arith.mulf %12, %14 : vector<64x16xf32>
      %c0_14 = arith.constant 0 : index
      %c0_15 = arith.constant 0 : index
      %16 = vector.load %arg6[%c0_14, %c0_15] : memref<1x16xf32, #tpu.memory_space<vmem>>, vector<1x16xf32>
      %17 = vector.broadcast %16 : vector<1x16xf32> to vector<64x16xf32>
      %18 = arith.addf %15, %17 : vector<64x16xf32>
      %c0_16 = arith.constant 0 : index
      %c0_17 = arith.constant 0 : index
      %19 = vector.load %arg7[%c0_16, %c0_17] : memref<64x16xbf16, #tpu.memory_space<vmem>>, vector<64x16xbf16>
      %20 = arith.extf %19 : vector<64x16xbf16> to vector<64x16xf32>
      %21 = arith.addf %18, %20 : vector<64x16xf32>
      %cst_18 = arith.constant 0.000000e+00 : f32
      %22 = vector.broadcast %cst_18 : f32 to vector<64x16xf32>
      %23 = arith.maximumf %21, %22 : vector<64x16xf32>
      %c0_19 = arith.constant 0 : index
      %c0_20 = arith.constant 0 : index
      %24 = vector.load %arg8[%c0_19, %c0_20] : memref<64x16xf32, #tpu.memory_space<vmem>>, vector<64x16xf32>
      tpu.vector_store %arg8[%c0_19, %c0_20], %23 {strides = array<i32>} : memref<64x16xf32, #tpu.memory_space<vmem>>, vector<64x16xf32>,
    } else {
    }
    return
  }
  func.func @transform_0(%arg0: i32, %arg1: i32, %arg2: i32) -> (i32, i32) {
    %c0_i32 = arith.constant 0 : i32
    return %arg0, %arg2 : i32, i32
  }
  func.func @transform_1(%arg0: i32, %arg1: i32, %arg2: i32) -> (i32, i32) {
    %c0_i32 = arith.constant 0 : i32
    return %arg2, %arg1 : i32, i32
  }
  func.func @transform_2(%arg0: i32, %arg1: i32, %arg2: i32) -> (i32, i32) {
    %c0_i32 = arith.constant 0 : i32
    %c0_i32_0 = arith.constant 0 : i32
    return %c0_i32, %arg1 : i32, i32
  }
  func.func @transform_3(%arg0: i32, %arg1: i32, %arg2: i32) -> (i32, i32) {
    %c0_i32 = arith.constant 0 : i32
    %c0_i32_0 = arith.constant 0 : i32
    return %c0_i32, %arg1 : i32, i32
  }
  func.func @transform_4(%arg0: i32, %arg1: i32, %arg2: i32) -> (i32, i32) {
    %c0_i32 = arith.constant 0 : i32
    return %arg0, %arg1 : i32, i32
  }
  func.func @transform_5(%arg0: i32, %arg1: i32, %arg2: i32) -> (i32, i32) {
    %c0_i32 = arith.constant 0 : i32
    return %arg0, %arg1 : i32, i32
  }
}

</mosaic_0001>

<bundles_post_ra>
// kernel: _lambda_.5
= control target key start
LH: loop header
LB: loop body
LE: loop exit
PB: predicated region body
PF: predicated region fallthrough
CT: control target
= control target key end

     0   :  { %10 = vsyncpa [#allocation4], 0  ;;  %s1132_s0 = inlined_call_operand.vmem [shape: bf16[128,4], index: 0, kind: input, shape index: {}]   ;;  %s1133_s1 = inlined_call_operand.vmem [shape: bf16[4,16], index: 1, kind: input, shape index: {}]   ;;  %s1134_s2 = inlined_call_operand.vmem [shape: f32[1,16], index: 2, kind: input, shape index: {}]   ;;  %s1135_s3 = inlined_call_operand.vmem [shape: f32[1,16], index: 3, kind: input, shape index: {}]   ;;  %s1136_s4 = inlined_call_operand.vmem [shape: bf16[128,16], index: 4, kind: input, shape index: {}]   ;;  %s1137_s5 = inlined_call_operand.hbm [shape: f32[128,16], index: 5, kind: output, shape index: {}]  }
   0x1   :  { %12 = vsyncpa [#allocation4 + $0x1], 0  ;;  %s971_s18 = smov 0   ;;  %s973_s19 = smov 0  }
   0x2   :  { %s975_s20 = smov 0   ;;  %s977_s21 = smov 0  }
   0x3   :  { %s979_s22 = smov 0   ;;  %s981_s23 = smov 0  }
   0x4 LB: > { %s728_s24 = sadd.s32 4294967295, %s935_s23   ;;  %s729_s25 = sadd.s32 4294967294, %s935_s23   ;;  %s935_s23 = sphi %s981_s23, %s18_s23   ;;  %s931_s22 = sphi %s979_s22, %s1144_s22   ;;  %s927_s21 = sphi %s977_s21, %s1143_s21   ;;  %s923_s20 = sphi %s975_s20, %s1142_s20   ;;  %s919_s19 = sphi %s973_s19, %s1141_s19   ;;  %s915_s18 = sphi %s971_s18, %s1140_s18  }
   0x5   : > { %s37_s26 = sadd.s32 1, %s931_s22  ;;  %s182_s27 = sadd.s32 1, %s923_s20 }
   0x6   : > { %p39_p0 = scmp.ge.s32.totalorder %s37_s26, 2  ;;  %p192_p1 = scmp.ne.s32.totalorder %s923_s20, %s919_s19 }
   0x7   : > { %p193_p2 = scmp.eq.s32.totalorder %s728_s24, 1  ;;  %p198_p3 = scmp.ne.s32.totalorder %s919_s19, %s915_s18 }
   0x8   : > { %s1146_s26 = smov (%p39_p0, %s37_s26), 0  ;;  %p199_p5 = scmp.eq.s32.totalorder %s729_s25, 1 }
   0x9   : > { %p1011_p4 = por %p193_p2, %p192_p1  ;;  %s177_s29 = ssub.s32 %s931_s22, %s1146_s26 }
   0xa   : > { %p735_p6 = scmp.ge.s32.totalorder %s935_s23, 1  ;;  %p180_p7 = scmp.eq.s32.totalorder %s177_s29, 0 }
   0xb   : > { %p1018_p8 = por %p199_p5, %p198_p3  ;;  %p263_p9 = scmp.lt.s32.totalorder %s935_s23, 3 }
   0xc   : > { %s1024_s6 = scalar_select %p180_p7, %s923_s20, %s182_s27  }
   0xd   : > { %p264_p10 = pnand %p735_p6, %p263_p9 }
   0xe   : > { %v377_v0 = vld [vmem:[%s1133_s1] sm:$0x3] (!%p264_p10)  ;;  %vm411_vm0 = vcmask (!%p264_p10), 1041408   ;;  %s737_s9 = sshll.u32 (!%p264_p10), %s927_s21, 3  ;;  %vm352_vm1 = vcmask (!%p264_p10), 130048   ;;  %v937_v2 = vmov (!%p264_p10), 0.0  }
   0xf   : > { %267 = sbr.rel (%p264_p10) target bundleno = 276 (0x114), region = 40  ;;  %793 = vmatprep.subr.msk.bf16.mxu0 (!%p264_p10), %vm411_vm0, %v377_v0  ;;  %794 = vmatprep.subr.msk.bf16.mxu1 (!%p264_p10), %vm411_vm0, %v377_v0  ;;  %v413_v1 = vsel (!%p264_p10), %vm411_vm0, %v377_v0, 0  ;;  %p316_p11 = scmp.lt.s32.totalorder (!%p264_p10), %s737_s9, 15  ;;  %355 = vst.msk [vmem:[#allocation2 + $0x10] sm:$0xff] (!%p264_p10), %vm352_vm1, %v937_v2  ;;  %353 = vst.msk [vmem:[#allocation2] sm:$0xff] (!%p264_p10), %vm352_vm1, %v937_v2  ;;  %vm398_vm2 = vcmask (!%p264_p10), 31744  }
  0x10   : > { %782 = vmatpush3.bf16.msra.mxu0 (!%p264_p10), %v413_v1  ;;  %792 = vmatpush3.bf16.msra.mxu1 (!%p264_p10), %v413_v1  ;;  %354 = vst.msk [vmem:[#allocation2 + $0x8] sm:$0xff] (!%p264_p10), %vm352_vm1, %v937_v2  ;;  %356 = vst.msk [vmem:[#allocation2 + $0x18] sm:$0xff] (!%p264_p10), %vm352_vm1, %v937_v2  ;;  %v749_v34 = vld [vmem:[%s1134_s2] ss:$0 sm:$0xff] (!%p264_p10)  ;;  %s312_s29 = sand.u32 (!%p264_p10), 1, %s919_s19   ;;  %s756_s8 = sshll.u32 (!%p264_p10), %s927_s21, 10 }
  0x11   : > { %357 = vst.msk [vmem:[#allocation2 + $0x20] sm:$0xff] (!%p264_p10), %vm352_vm1, %v937_v2  ;;  %358 = vst.msk [vmem:[#allocation2 + $0x28] sm:$0xff] (!%p264_p10), %vm352_vm1, %v937_v2  ;;  %v750_v39 = vld [vmem:[%s1135_s3] ss:$0 sm:$0xff] (!%p264_p10)  ;;  %s736_s7 = sshll.u32 (!%p264_p10), %s312_s29, 6  ;;  %s1075_s12 = scalar_lea.hbm (!%p264_p10), %s1137_s5, %s756_s8 }
  0x12   : > { %359 = vst.msk [vmem:[#allocation2 + $0x30] sm:$0xff] (!%p264_p10), %vm352_vm1, %v937_v2  ;;  %360 = vst.msk [vmem:[#allocation2 + $0x38] sm:$0xff] (!%p264_p10), %vm352_vm1, %v937_v2  ;;  %s938_s15 = smov (!%p264_p10), [#allocation3]  }
  0x16   : > { %s1148_s9 = smov (!%p316_p11, %s737_s9), 15  ;;  %v363_v7 = vld [vmem:[#allocation2 + $0x10] sm:$0xff]  ;;  %v361_v9 = vld [vmem:[#allocation2] sm:$0xff] }
  0x17   : > { %s738_s10 = sshll.u32 %s1148_s9, 2  ;;  %v364_v12 = vld [vmem:[#allocation2 + $0x18] sm:$0xff]  ;;  %v362_v17 = vld [vmem:[#allocation2 + $0x8] sm:$0xff]  ;;  %s314_s9 = scalar_lea.vmem [#allocation3], %s736_s7 }
  0x18   : > { %s322_s13 = scalar_lea.vmem %s1132_s0, %s738_s10  ;;  %v365_v11 = vld [vmem:[#allocation2 + $0x20] sm:$0xff]  ;;  %v366_v22 = vld [vmem:[#allocation2 + $0x28] sm:$0xff]  ;;  %s344_s16 = scalar_lea.vmem %s1136_s4, %s738_s10 }
  0x19   : > { %v853_v3 = vld [vmem:[%s322_s13] sm:$0xff]   ;;  %v854_v4 = vld [vmem:[%s322_s13 + $0x10] sm:$0xff]   ;;  %v855_v5 = vld [vmem:[%s322_s13 + $0x8] sm:$0xff]   ;;  %s593_s10 = sshll.u32 %s314_s9, 4  ;;  %s1077_s10 = int_to_ptr.vmem [resolvable:$true] %s593_s10 }
  0x1a   : > { %783 = vmatprep.mubr.msk.bf16.mxu0 %vm398_vm2, %v853_v3  ;;  %787 = vmatprep.mubr.msk.bf16.mxu1 %vm398_vm2, %v854_v4  ;;  %v856_v6 = vld [vmem:[%s322_s13 + $0x18] sm:$0xff]   ;;  %v367_v8 = vld [vmem:[#allocation2 + $0x30] sm:$0xff]  ;;  %v758_v31 = vld [vmem:[%s344_s16] sm:$0xff]   ;;  %s1086_s13 = scalar_lea.sflag [#allocation4], %s312_s29  ;;  %s857_s14 = scalar_lea.vmem %s1077_s10, 1024 }
  0x1b   : > { %784 = vmatmul.mubr.msk.bf16.vlgmr.msra.gmra.mrb[0].mxu0 %vm398_vm2, %v855_v5  ;;  %788 = vmatmul.mubr.msk.bf16.vlgmr.msra.gmra.mrb[0].mxu1 %vm398_vm2, %v856_v6  ;;  %v368_v16 = vld [vmem:[#allocation2 + $0x38] sm:$0xff]  ;;  %v773_v32 = vld [vmem:[%s344_s16 + $0x8] sm:$0xff]   ;;  %v774_v33 = vld [vmem:[%s344_s16 + $0x10] sm:$0xff]   ;;  %v759_v36 = vunpack.c.l.bf16 %v758_v31  ;;  %v760_v37 = vunpack.c.h.bf16 %v758_v31  ;;  %p858_p12 = scmp.ne.s32.totalorder %s1077_s10, %s857_s14 }
  0x1c   : > { %v775_v35 = vld [vmem:[%s344_s16 + $0x18] sm:$0xff]   ;;  %v763_v40 = vunpack.c.l.bf16 %v773_v32  ;;  %v764_v41 = vunpack.c.h.bf16 %v773_v32  ;;  %v767_v42 = vunpack.c.l.bf16 %v774_v33  ;;  %v768_v46 = vunpack.c.h.bf16 %v774_v33  ;;  %s861_s16 = sshll.u32 %s938_s15, 4  ;;  %s862_s16 = int_to_ptr.vmem [resolvable:$false] %s861_s16 }
  0x1d   : > { %v771_v47 = vunpack.c.l.bf16 %v775_v35  ;;  %v772_v52 = vunpack.c.h.bf16 %v775_v35  ;;  %p859_p13 = pnand %p858_p12, %p1011_p4  ;;  %s863_s17 = scalar_lea.vmem %s862_s16, 2048 }
  0x1e   : > { %p864_p1 = scmp.lt.s32.totalorder %s1077_s10, %s862_s16  ;;  %p865_p2 = scmp.lt.s32.totalorder %s863_s17, %s857_s14 }
  0x1f   : > { %p860_p0 = pneg %p859_p13 }
  0x20   : > { %p866_p3 = por %p865_p2, %p864_p1 }
  0x22   : > { %p867_p5 = pnand %p866_p3, %p860_p0 }
  0xee   : > { %v785_v10 = vpop.f32.mrb[0].mxu0  ;;  %v789_v14 = vpop.f32.mrb[0].mxu1 }
  0xef   : > { %v482_v13 = vadd.f32 %v785_v10, %v363_v7  ;;  %v449_v15 = vpop.f32.mrb[1].mxu0  ;;  %v486_v18 = vadd.f32 %v789_v14, %v367_v8  ;;  %v465_v20 = vpop.f32.mrb[1].mxu1 }
  0xf0   : > { %v480_v19 = vadd.f32 %v449_v15, %v361_v9  ;;  %v786_v21 = vpop.f32.mrb[2].mxu0  ;;  %v484_v23 = vadd.f32 %v465_v20, %v365_v11  ;;  %v790_v25 = vpop.f32.mrb[2].mxu1 }
  0xf1   : > { %491 = vst.msk [vmem:[#allocation2 + $0x10] sm:$0xff] %vm352_vm1, %v482_v13  ;;  %v483_v24 = vadd.f32 %v786_v21, %v364_v12  ;;  %v452_v26 = vpop.f32.mrb[3].mxu0  ;;  %495 = vst.msk [vmem:[#allocation2 + $0x30] sm:$0xff] %vm352_vm1, %v486_v18  ;;  %v487_v27 = vadd.f32 %v790_v25, %v368_v16  ;;  %v468_v29 = vpop.f32.mrb[3].mxu1 }
  0xf2   : > { %489 = vst.msk [vmem:[#allocation2] sm:$0xff] %vm352_vm1, %v480_v19  ;;  %v481_v28 = vadd.f32 %v452_v26, %v362_v17  ;;  %493 = vst.msk [vmem:[#allocation2 + $0x20] sm:$0xff] %vm352_vm1, %v484_v23  ;;  %v485_v30 = vadd.f32 %v468_v29, %v366_v22 }
  0xf3   : > { %492 = vst.msk [vmem:[#allocation2 + $0x18] sm:$0xff] %vm352_vm1, %v483_v24  ;;  %496 = vst.msk [vmem:[#allocation2 + $0x38] sm:$0xff] %vm352_vm1, %v487_v27 }
  0xf4   : > { %490 = vst.msk [vmem:[#allocation2 + $0x8] sm:$0xff] %vm352_vm1, %v481_v28  ;;  %494 = vst.msk [vmem:[#allocation2 + $0x28] sm:$0xff] %vm352_vm1, %v485_v30 }
  0xf8   : > { %v502_v38 = vld [vmem:[#allocation2 + $0x10] sm:$0xff] }
  0xf9   : > { %v517_v43 = vmul.f32 %v749_v34, %v502_v38  ;;  %v506_v44 = vld [vmem:[#allocation2 + $0x30] sm:$0xff]  ;;  %v500_v45 = vld [vmem:[#allocation2] sm:$0xff] }
  0xfa   : > { %v521_v48 = vmul.f32 %v749_v34, %v506_v44  ;;  %v515_v49 = vmul.f32 %v749_v34, %v500_v45  ;;  %v504_v50 = vld [vmem:[#allocation2 + $0x20] sm:$0xff]  ;;  %v503_v51 = vld [vmem:[#allocation2 + $0x18] sm:$0xff] }
  0xfb   : > { %v532_v53 = vadd.f32 %v750_v39, %v517_v43  ;;  %v519_v54 = vmul.f32 %v749_v34, %v504_v50  ;;  %v518_v55 = vmul.f32 %v749_v34, %v503_v51  ;;  %v507_v56 = vld [vmem:[#allocation2 + $0x38] sm:$0xff]  ;;  %v501_v57 = vld [vmem:[#allocation2 + $0x8] sm:$0xff] }
  0xfc   : > { %v536_v58 = vadd.f32 %v750_v39, %v521_v48  ;;  %v530_v59 = vadd.f32 %v750_v39, %v515_v49  ;;  %v522_v60 = vmul.f32 %v749_v34, %v507_v56  ;;  %v516_v61 = vmul.f32 %v749_v34, %v501_v57  ;;  %v505_v62 = vld [vmem:[#allocation2 + $0x28] sm:$0xff] }
  0xfd   : > { %v556_v63 = vadd.f32 %v763_v40, %v532_v53  ;;  %v534_v0 = vadd.f32 %v750_v39, %v519_v54  ;;  %v533_v1 = vadd.f32 %v750_v39, %v518_v55  ;;  %v520_v2 = vmul.f32 %v749_v34, %v505_v62 }
  0xfe   : > { %v560_v3 = vadd.f32 %v771_v47, %v536_v58  ;;  %v554_v4 = vadd.f32 %v759_v36, %v530_v59  ;;  %v537_v5 = vadd.f32 %v750_v39, %v522_v60  ;;  %v531_v6 = vadd.f32 %v750_v39, %v516_v61 }
  0xff   : > { %v564_v7 = vmax.f32 %v556_v63, 0.0  ;;  %v558_v8 = vadd.f32 %v767_v42, %v534_v0  ;;  %v557_v9 = vadd.f32 %v764_v41, %v533_v1  ;;  %v535_v10 = vadd.f32 %v750_v39, %v520_v2 }
 0x100   : > { %v568_v11 = vmax.f32 %v560_v3, 0.0  ;;  %v562_v12 = vmax.f32 %v554_v4, 0.0  ;;  %v561_v13 = vadd.f32 %v772_v52, %v537_v5  ;;  %v555_v14 = vadd.f32 %v760_v37, %v531_v6 }
 0x101   : > { %v566_v15 = vmax.f32 %v558_v8, 0.0  ;;  %v565_v16 = vmax.f32 %v557_v9, 0.0  ;;  %v559_v17 = vadd.f32 %v768_v46, %v535_v10  ;;  %572 = vst.msk [vmem:[%s314_s9 + $0x10] sm:$0xff] %vm352_vm1, %v564_v7 }
 0x102   : > { %v569_v18 = vmax.f32 %v561_v13, 0.0  ;;  %v563_v19 = vmax.f32 %v555_v14, 0.0  ;;  %570 = vst.msk [vmem:[%s314_s9] sm:$0xff] %vm352_vm1, %v562_v12  ;;  %576 = vst.msk [vmem:[%s314_s9 + $0x30] sm:$0xff] %vm352_vm1, %v568_v11 }
 0x103   : > { %v567_v20 = vmax.f32 %v559_v17, 0.0  ;;  %573 = vst.msk [vmem:[%s314_s9 + $0x18] sm:$0xff] %vm352_vm1, %v565_v16  ;;  %574 = vst.msk [vmem:[%s314_s9 + $0x20] sm:$0xff] %vm352_vm1, %v566_v15 }
 0x104   : > { %571 = vst.msk [vmem:[%s314_s9 + $0x8] sm:$0xff] %vm352_vm1, %v563_v19  ;;  %577 = vst.msk [vmem:[%s314_s9 + $0x38] sm:$0xff] %vm352_vm1, %v569_v18 }
 0x105   : > { %575 = vst.msk [vmem:[%s314_s9 + $0x28] sm:$0xff] %vm352_vm1, %v567_v20 }
 0x106   : > { %870 = shalt.err (!%p867_p5)
}
 0x107   : > { %s871_s24 = scalar_lea.hbm %s1075_s12, 1024  ;;  %s875_s29 = scalar_lea.hbm %s1137_s5, 2048 }
 0x108   : > { %p872_p6 = scmp.ne.s32.totalorder %s1075_s12, %s871_s24  ;;  %p876_p10 = scmp.lt.u32.totalorder %s1075_s12, %s1137_s5 }
 0x109   : > { %p877_p11 = scmp.lt.u32.totalorder %s875_s29, %s871_s24  ;;  %p879_p13 = scmp.lt.u32.totalorder %s871_s24, %s1075_s12 }
 0x10a   : > { %p873_p7 = pnand %p872_p6, %p1011_p4 }
 0x10b   : > { %p878_p12 = por %p877_p11, %p876_p10 }
 0x10c   : > { %p874_p9 = pneg %p873_p7 }
 0x10d   : > { %p880_p0 = por %p879_p13, %p878_p12 }
 0x10f   : > { %p881_p1 = pnand %p880_p0, %p874_p9 }
 0x111   : > { %884 = shalt.err (!%p881_p1)
}
 0x112   : > { %s939_s9 = smov 128   ;;  %s940_s21 = smov 8  }
 0x113   : > { %795 = dma.vmem_to_hbm [thread:$0]  (%p1011_p4), %s1077_s10, 1024, %s1075_s12, %s1086_s13, %s939_s9, %s939_s9, %s940_s21  }
 0x114 PF: > { %p801_p2 = scmp.ge.s32.totalorder %s935_s23, 2  ;;  %s608_s11 = sand.u32 1, %s915_s18  }
 0x115   : > { %s609_s14 = scalar_lea.sflag [#allocation4], %s608_s11 }
 0x116   : > { %p798_p3 = pnand %p801_p2, %p1018_p8 }
 0x118   : > { %910 = dma.done.wait (!%p798_p3), %s609_s14, 1024  }
 0x119   : > { %912 = vsyncadd (!%p798_p3), %s609_s14, 4294966272  ;;  %s18_s23 = sadd.s32 1, %s935_s23   ;;  %s1140_s18 = smov %s919_s19 }
 0x11a   : > { %p15_p5 = scmp.ge.s32.totalorder %s18_s23, 4   ;;  %s1141_s19 = smov %s923_s20 }
 0x11b   : > { %s1142_s20 = smov %s1024_s6  ;;  %s1143_s21 = smov %s931_s22 }
 0x11c   : > { %s1144_s22 = smov %s1146_s26  ;;  %17 = sbr.rel (!%p15_p5) target bundleno = 4 (0x4), region = 95 }
 0x123   :  { %614 = vsyncpa [#allocation4], 1 }
 0x124   :  { %616 = vsyncpa [#allocation4 + $0x1], 1 }

// kernel: _lambda_.3
= control target key start
LH: loop header
LB: loop body
LE: loop exit
PB: predicated region body
PF: predicated region fallthrough
CT: control target
= control target key end

     0   :  { %s804_s15 = smov 0   ;;  %s806_s16 = smov 0   ;;  %s883_s0 = inlined_call_operand.vmem [shape: bf16[128,16], index: 0, kind: input, shape index: {}]   ;;  %s884_s1 = inlined_call_operand.vmem [shape: bf16[16,4], index: 1, kind: input, shape index: {}]   ;;  %s885_s2 = inlined_call_operand.vmem [shape: f32[1,4], index: 2, kind: input, shape index: {}]   ;;  %s886_s3 = inlined_call_operand.vmem [shape: f32[1,4], index: 3, kind: input, shape index: {}]   ;;  %s887_s4 = inlined_call_operand.vmem [shape: bf16[128,4], index: 4, kind: output, shape index: {}]  }
   0x1   :  { %s808_s17 = smov 0  }
   0x2 LB: > { %s33_s18 = sadd.s32 1, %s772_s16  ;;  %p673_p0 = scmp.ge.s32.totalorder %s776_s17, 1  ;;  %s776_s17 = sphi %s808_s17, %s14_s17   ;;  %s772_s16 = sphi %s806_s16, %s890_s16   ;;  %s768_s15 = sphi %s804_s15, %s889_s15  }
   0x3   : > { %p35_p1 = scmp.ge.s32.totalorder %s33_s18, 2  ;;  %p221_p2 = scmp.lt.s32.totalorder %s776_s17, 3 }
   0x5   : > { %s892_s18 = smov (%p35_p1, %s33_s18), 0  ;;  %p222_p3 = pnand %p673_p0, %p221_p2 }
   0x6   : > { %v749_v0 = vld [vmem:[%s884_s1] sm:$0xff] (!%p222_p3)   ;;  %s674_s21 = sshll.u32 (!%p222_p3), %s768_s15, 3  ;;  %vm305_vm0 = vcmask (!%p222_p3), 31744   ;;  %v778_v1 = vmov (!%p222_p3), 0.0   ;;  %vm358_vm1 = vcmask (!%p222_p3), 130048   ;;  %vm534_vm2 = vcmask (!%p222_p3), 27648  }
   0x7   : > { %225 = sbr.rel (%p222_p3) target bundleno = 254 (0xfe), region = 36  ;;  %p825_p4 = scmp.lt.s32.totalorder (!%p222_p3), %s674_s21, 15  ;;  %712 = vmatprep.subr.bf16.mxu0 (!%p222_p3), %v749_v0  ;;  %722 = vmatprep.subr.bf16.mxu1 (!%p222_p3), %v749_v0  ;;  %308 = vst.msk [vmem:[#allocation2 + $0x10] sm:$0xff] (!%p222_p3), %vm305_vm0, %v778_v1  ;;  %306 = vst.msk [vmem:[#allocation2] sm:$0xff] (!%p222_p3), %vm305_vm0, %v778_v1  ;;  %v687_v30 = vld [vmem:[%s885_s2] ss:$0 sm:$0xff] (!%p222_p3) }
   0x8   : > { %307 = vst.msk [vmem:[#allocation2 + $0x8] sm:$0xff] (!%p222_p3), %vm305_vm0, %v778_v1  ;;  %309 = vst.msk [vmem:[#allocation2 + $0x18] sm:$0xff] (!%p222_p3), %vm305_vm0, %v778_v1  ;;  %713 = vmatpush3.bf16.msra.mxu0 (!%p222_p3), %v749_v0  ;;  %723 = vmatpush3.bf16.msra.mxu1 (!%p222_p3), %v749_v0  ;;  %v688_v32 = vld [vmem:[%s886_s3] ss:$0 sm:$0xff] (!%p222_p3) }
   0x9   : > { %310 = vst.msk [vmem:[#allocation2 + $0x20] sm:$0xff] (!%p222_p3), %vm305_vm0, %v778_v1  ;;  %311 = vst.msk [vmem:[#allocation2 + $0x28] sm:$0xff] (!%p222_p3), %vm305_vm0, %v778_v1 }
   0xa   : > { %312 = vst.msk [vmem:[#allocation2 + $0x30] sm:$0xff] (!%p222_p3), %vm305_vm0, %v778_v1  ;;  %313 = vst.msk [vmem:[#allocation2 + $0x38] sm:$0xff] (!%p222_p3), %vm305_vm0, %v778_v1 }
   0xe   : > { %s894_s21 = smov (!%p825_p4, %s674_s21), 15  ;;  %v316_v6 = vld [vmem:[#allocation2 + $0x10] sm:$0xff]  ;;  %v314_v8 = vld [vmem:[#allocation2] sm:$0xff] }
   0xf   : > { %s675_s23 = sshll.u32 %s894_s21, 2  ;;  %v317_v11 = vld [vmem:[#allocation2 + $0x18] sm:$0xff]  ;;  %v315_v16 = vld [vmem:[#allocation2 + $0x8] sm:$0xff] }
  0x10   : > { %s274_s26 = scalar_lea.vmem %s883_s0, %s675_s23  ;;  %v318_v10 = vld [vmem:[#allocation2 + $0x20] sm:$0xff]  ;;  %v319_v21 = vld [vmem:[#allocation2 + $0x28] sm:$0xff]  ;;  %s298_s7 = scalar_lea.vmem %s887_s4, %s675_s23 }
  0x11   : > { %v750_v2 = vld [vmem:[%s274_s26] sm:$0xff]   ;;  %v751_v3 = vld [vmem:[%s274_s26 + $0x10] sm:$0xff]   ;;  %v752_v4 = vld [vmem:[%s274_s26 + $0x8] sm:$0xff]  }
  0x12   : > { %714 = vmatprep.mubr.msk.bf16.mxu0 %vm358_vm1, %v750_v2  ;;  %718 = vmatprep.mubr.msk.bf16.mxu1 %vm358_vm1, %v751_v3  ;;  %v753_v5 = vld [vmem:[%s274_s26 + $0x18] sm:$0xff]   ;;  %v320_v7 = vld [vmem:[#allocation2 + $0x30] sm:$0xff] }
  0x13   : > { %715 = vmatmul.mubr.msk.bf16.vlgmr.msra.gmra.mrb[0].mxu0 %vm358_vm1, %v752_v4  ;;  %719 = vmatmul.mubr.msk.bf16.vlgmr.msra.gmra.mrb[0].mxu1 %vm358_vm1, %v753_v5  ;;  %v321_v15 = vld [vmem:[#allocation2 + $0x38] sm:$0xff] }
  0xe6   : > { %v716_v9 = vpop.f32.mrb[0].mxu0  ;;  %v720_v13 = vpop.f32.mrb[0].mxu1 }
  0xe7   : > { %v438_v12 = vadd.f32 %v716_v9, %v316_v6  ;;  %v405_v14 = vpop.f32.mrb[1].mxu0  ;;  %v442_v17 = vadd.f32 %v720_v13, %v320_v7  ;;  %v421_v19 = vpop.f32.mrb[1].mxu1 }
  0xe8   : > { %v436_v18 = vadd.f32 %v405_v14, %v314_v8  ;;  %v717_v20 = vpop.f32.mrb[2].mxu0  ;;  %v440_v22 = vadd.f32 %v421_v19, %v318_v10  ;;  %v721_v24 = vpop.f32.mrb[2].mxu1 }
  0xe9   : > { %447 = vst.msk [vmem:[#allocation2 + $0x10] sm:$0xff] %vm305_vm0, %v438_v12  ;;  %v439_v23 = vadd.f32 %v717_v20, %v317_v11  ;;  %v408_v25 = vpop.f32.mrb[3].mxu0  ;;  %451 = vst.msk [vmem:[#allocation2 + $0x30] sm:$0xff] %vm305_vm0, %v442_v17  ;;  %v443_v26 = vadd.f32 %v721_v24, %v321_v15  ;;  %v424_v28 = vpop.f32.mrb[3].mxu1 }
  0xea   : > { %445 = vst.msk [vmem:[#allocation2] sm:$0xff] %vm305_vm0, %v436_v18  ;;  %v437_v27 = vadd.f32 %v408_v25, %v315_v16  ;;  %449 = vst.msk [vmem:[#allocation2 + $0x20] sm:$0xff] %vm305_vm0, %v440_v22  ;;  %v441_v29 = vadd.f32 %v424_v28, %v319_v21 }
  0xeb   : > { %448 = vst.msk [vmem:[#allocation2 + $0x18] sm:$0xff] %vm305_vm0, %v439_v23  ;;  %452 = vst.msk [vmem:[#allocation2 + $0x38] sm:$0xff] %vm305_vm0, %v443_v26 }
  0xec   : > { %446 = vst.msk [vmem:[#allocation2 + $0x8] sm:$0xff] %vm305_vm0, %v437_v27  ;;  %450 = vst.msk [vmem:[#allocation2 + $0x28] sm:$0xff] %vm305_vm0, %v441_v29 }
  0xf0   : > { %v458_v31 = vld [vmem:[#allocation2 + $0x10] sm:$0xff] }
  0xf1   : > { %v473_v33 = vmul.f32 %v687_v30, %v458_v31  ;;  %v462_v34 = vld [vmem:[#allocation2 + $0x30] sm:$0xff]  ;;  %v456_v35 = vld [vmem:[#allocation2] sm:$0xff] }
  0xf2   : > { %v477_v36 = vmul.f32 %v687_v30, %v462_v34  ;;  %v471_v37 = vmul.f32 %v687_v30, %v456_v35  ;;  %v460_v38 = vld [vmem:[#allocation2 + $0x20] sm:$0xff]  ;;  %v459_v39 = vld [vmem:[#allocation2 + $0x18] sm:$0xff] }
  0xf3   : > { %v488_v40 = vadd.f32 %v688_v32, %v473_v33  ;;  %v475_v41 = vmul.f32 %v687_v30, %v460_v38  ;;  %v474_v42 = vmul.f32 %v687_v30, %v459_v39  ;;  %v463_v43 = vld [vmem:[#allocation2 + $0x38] sm:$0xff]  ;;  %v457_v44 = vld [vmem:[#allocation2 + $0x8] sm:$0xff] }
  0xf4   : > { %v492_v45 = vadd.f32 %v688_v32, %v477_v36  ;;  %v486_v46 = vadd.f32 %v688_v32, %v471_v37  ;;  %v478_v47 = vmul.f32 %v687_v30, %v463_v43  ;;  %v472_v48 = vmul.f32 %v687_v30, %v457_v44  ;;  %v461_v49 = vld [vmem:[#allocation2 + $0x28] sm:$0xff] }
  0xf5   : > { %v496_v50 = vmax.f32 %v488_v40, 0.0  ;;  %v490_v51 = vadd.f32 %v688_v32, %v475_v41  ;;  %v489_v52 = vadd.f32 %v688_v32, %v474_v42  ;;  %v476_v53 = vmul.f32 %v687_v30, %v461_v49 }
  0xf6   : > { %v500_v54 = vmax.f32 %v492_v45, 0.0  ;;  %v494_v55 = vmax.f32 %v486_v46, 0.0  ;;  %v493_v56 = vadd.f32 %v688_v32, %v478_v47  ;;  %v487_v57 = vadd.f32 %v688_v32, %v472_v48 }
  0xf7   : > { %v701_v58 = vpack.c.bf16 %v496_v50, %v496_v50  ;;  %v498_v59 = vmax.f32 %v490_v51, 0.0  ;;  %v497_v60 = vmax.f32 %v489_v52, 0.0  ;;  %v491_v61 = vadd.f32 %v688_v32, %v476_v53 }
  0xf8   : > { %v705_v62 = vpack.c.bf16 %v500_v54, %v500_v54  ;;  %v699_v63 = vpack.c.bf16 %v494_v55, %v494_v55  ;;  %v501_v0 = vmax.f32 %v493_v56, 0.0  ;;  %v495_v1 = vmax.f32 %v487_v57, 0.0 }
  0xf9   : > { %537 = vst.msk [vmem:[%s298_s7 + $0x8] sm:$0xf] %vm534_vm2, %v701_v58  ;;  %v703_v2 = vpack.c.bf16 %v498_v59, %v498_v59  ;;  %v702_v3 = vpack.c.bf16 %v497_v60, %v497_v60  ;;  %v499_v4 = vmax.f32 %v491_v61, 0.0 }
  0xfa   : > { %541 = vst.msk [vmem:[%s298_s7 + $0x18] sm:$0xf] %vm534_vm2, %v705_v62  ;;  %535 = vst.msk [vmem:[%s298_s7] sm:$0xf] %vm534_vm2, %v699_v63  ;;  %v706_v5 = vpack.c.bf16 %v501_v0, %v501_v0  ;;  %v700_v6 = vpack.c.bf16 %v495_v1, %v495_v1 }
  0xfb   : > { %539 = vst.msk [vmem:[%s298_s7 + $0x10] sm:$0xf] %vm534_vm2, %v703_v2  ;;  %538 = vst.msk [vmem:[%s298_s7 + $0xc] sm:$0xf] %vm534_vm2, %v702_v3  ;;  %v704_v7 = vpack.c.bf16 %v499_v4, %v499_v4 }
  0xfc   : > { %542 = vst.msk [vmem:[%s298_s7 + $0x1c] sm:$0xf] %vm534_vm2, %v706_v5  ;;  %536 = vst.msk [vmem:[%s298_s7 + $0x4] sm:$0xf] %vm534_vm2, %v700_v6 }
  0xfd   : > { %540 = vst.msk [vmem:[%s298_s7 + $0x14] sm:$0xf] %vm534_vm2, %v704_v7 }
  0xfe PF: > { %s14_s17 = sadd.s32 1, %s776_s17   ;;  %s889_s15 = smov %s772_s16 }
  0xff   : > { %p11_p5 = scmp.ge.s32.totalorder %s14_s17, 4   ;;  %s890_s16 = smov %s892_s18 }
 0x101   :  { %13 = sbr.rel (!%p11_p5) target bundleno = 2 (0x2), region = 83 }

// kernel: _lambda_.4
= control target key start
LH: loop header
LB: loop body
LE: loop exit
PB: predicated region body
PF: predicated region fallthrough
CT: control target
= control target key end

     0   :  { %s2535_s15 = smov 0   ;;  %s2537_s16 = smov 0   ;;  %s3029_s0 = inlined_call_operand.vmem [shape: bf16[1,2,10,10,4], index: 0, kind: input, shape index: {}]   ;;  %s3030_s1 = inlined_call_operand.vmem [shape: bf16[9,4,4], index: 1, kind: input, shape index: {}]   ;;  %s3031_s2 = inlined_call_operand.vmem [shape: f32[1,4], index: 2, kind: input, shape index: {}]   ;;  %s3032_s3 = inlined_call_operand.vmem [shape: f32[1,4], index: 3, kind: input, shape index: {}]   ;;  %s3033_s4 = inlined_call_operand.vmem [shape: bf16[2,8,8,4], index: 4, kind: output, shape index: {}]  }
   0x1   :  { %s2539_s17 = smov 0  }
   0x2 LB: > { %s33_s18 = sadd.s32 1, %s2503_s16  ;;  %p2051_p0 = scmp.ge.s32.totalorder %s2507_s17, 1  ;;  %s2507_s17 = sphi %s2539_s17, %s14_s17   ;;  %s2503_s16 = sphi %s2537_s16, %s3039_s16   ;;  %s2499_s15 = sphi %s2535_s15, %s3038_s15  }
   0x3   : > { %p35_p1 = scmp.ge.s32.totalorder %s33_s18, 2  ;;  %p218_p2 = scmp.lt.s32.totalorder %s2507_s17, 3 }
   0x5   : > { %s3041_s18 = smov (%p35_p1, %s33_s18), 0  ;;  %p219_p3 = pnand %p2051_p0, %p218_p2 }
   0x6   : > { %v322_v0 = vld [vmem:[%s3030_s1] sm:$0x3] (!%p219_p3)  ;;  %vm356_vm0 = vcmask (!%p219_p3), 1041408   ;;  %p263_p4 = scmp.lt.s32.totalorder (!%p219_p3), %s2499_s15, 1  ;;  %v2561_v2 = vld [vmem:[%s3030_s1 + $0x8] sm:$0x3] (!%p219_p3) }
   0x7   : > { %222 = sbr.rel (%p219_p3) target bundleno = 342 (0x156), region = 36  ;;  %2437 = vmatprep.subr.msk.bf16.mxu1 (!%p219_p3), %vm356_vm0, %v322_v0  ;;  %v358_v1 = vsel (!%p219_p3), %vm356_vm0, %v322_v0, 0  ;;  %v2063_v3 = vld [vmem:[%s3030_s1 + $0x2] sm:$0x3] (!%p219_p3)  ;;  %vm297_vm1 = vcmask (!%p219_p3), 31744   ;;  %2441 = vmatprep.subr.msk.bf16.mxu0 (!%p219_p3), %vm356_vm0, %v2561_v2  ;;  %v2572_v4 = vsel (!%p219_p3), %vm356_vm0, %v2561_v2, 0 }
   0x8   : > { %2274 = vmatpush3.bf16.msra.mxu1 (!%p219_p3), %v358_v1  ;;  %2314 = vmatpush3.bf16.msra.mxu0 (!%p219_p3), %v2572_v4  ;;  %v2147_v5 = vld [vmem:[%s3030_s1 + $0xa] sm:$0x3] (!%p219_p3)  ;;  %v2582_v6 = vld [vmem:[%s3030_s1 + $0xc] sm:$0x3] (!%p219_p3)  ;;  %v2509_v7 = vmov (!%p219_p3), 0.0   ;;  %v591_v9 = vsel (!%p219_p3), %vm356_vm0, %v2063_v3, 0 }
   0x9   : > { %2438 = vmatprep.subr.msk.bf16.mxu1 (!%p219_p3), %vm356_vm0, %v2063_v3  ;;  %300 = vst.msk [vmem:[#allocation2 + $0x10] sm:$0xff] (!%p219_p3), %vm297_vm1, %v2509_v7  ;;  %298 = vst.msk [vmem:[#allocation2] sm:$0xff] (!%p219_p3), %vm297_vm1, %v2509_v7  ;;  %2443 = vmatprep.subr.msk.bf16.mxu0 (!%p219_p3), %vm356_vm0, %v2147_v5  ;;  %v2080_v8 = vld [vmem:[%s3030_s1 + $0x4] sm:$0x3] (!%p219_p3)  ;;  %v2599_v10 = vsel (!%p219_p3), %vm356_vm0, %v2147_v5, 0  ;;  %v2608_v11 = vsel (!%p219_p3), %vm356_vm0, %v2582_v6, 0 }
   0xa   : > { %299 = vst.msk [vmem:[#allocation2 + $0x8] sm:$0xff] (!%p219_p3), %vm297_vm1, %v2509_v7  ;;  %301 = vst.msk [vmem:[#allocation2 + $0x18] sm:$0xff] (!%p219_p3), %vm297_vm1, %v2509_v7  ;;  %vm449_vm2 = vsmask.f32 (!%p219_p3), 3328  ;;  %vm450_vm3 = vsmask.f32 (!%p219_p3), 7440 }
   0xb   : > { %302 = vst.msk [vmem:[#allocation2 + $0x20] sm:$0xff] (!%p219_p3), %vm297_vm1, %v2509_v7  ;;  %303 = vst.msk [vmem:[#allocation2 + $0x28] sm:$0xff] (!%p219_p3), %vm297_vm1, %v2509_v7  ;;  %v2611_v12 = vsel (!%p219_p3), %vm356_vm0, %v2080_v8, 0  ;;  %v2616_v13 = vld [vmem:[%s3030_s1 + $0xe] sm:$0x3] (!%p219_p3)  ;;  %vm690_vm5 = vcmask (!%p219_p3), 1042432  }
   0xc   : > { %304 = vst.msk [vmem:[#allocation2 + $0x30] sm:$0xff] (!%p219_p3), %vm297_vm1, %v2509_v7  ;;  %305 = vst.msk [vmem:[#allocation2 + $0x38] sm:$0xff] (!%p219_p3), %vm297_vm1, %v2509_v7  ;;  %v2621_v14 = vld [vmem:[%s3030_s1 + $0x6] sm:$0x3] (!%p219_p3)  ;;  %v2630_v18 = vsel (!%p219_p3), %vm356_vm0, %v2616_v13, 0  ;;  %vm691_vm6 = vcmask (!%p219_p3), 1046532  }
   0xd   : > { %v2634_v19 = vsel (!%p219_p3), %vm356_vm0, %v2621_v14, 0  ;;  %vm2662_vm4 = vmor (!%p219_p3), %vm449_vm2, %vm450_vm3  ;;  %vm1906_vm8 = vcmask (!%p219_p3), 27648  }
   0xe   : > { %s3043_s15 = smov (!%p263_p4, %s2499_s15), 1  ;;  %vm2705_vm7 = vmor %vm690_vm5, %vm691_vm6 }
   0xf   : > { %s2447_s29 = smul.u32 80, %s3043_s15  ;;  %s2227_s23 = sshll.u32 %s3043_s15, 5 }
  0x10   : > { %s3002_s26 = scalar_lea.vmem %s3033_s4, %s2227_s23 }
  0x11   : > { %s2604_s8 = scalar_lea.vmem %s3029_s0, %s2447_s29 }
  0x12   : > { %v2473_v15 = vld [vmem:[%s2604_s8] ss:$8 sps:$4 sm:$0xff]   ;;  %v2474_v16 = vld [vmem:[%s2604_s8 + $0x10] ss:$8 sps:$4 sm:$0xff]   ;;  %v2639_v21 = vld [vmem:[%s2604_s8 + $0xc] sm:$0x1] }
  0x13   : > { %2275 = vmatprep.mubr.msk.bf16.mxu1 %vm297_vm1, %v2473_v15  ;;  %v2475_v17 = vld [vmem:[%s2604_s8 + $0x20] ss:$8 sps:$4 sm:$0xff]   ;;  %v2108_v22 = vld [vmem:[%s2604_s8 + $0x10] sm:$0xf]  ;;  %v2644_v24 = vld [vmem:[%s2604_s8 + $0x14] sm:$0x1] }
  0x14   : > { %2276 = vmatmul.mubr.msk.bf16.vlgmr.msra.gmra.mrb[0].mxu1 %vm297_vm1, %v2474_v16  ;;  %v2106_v20 = vld [vmem:[%s2604_s8 + $0x8] sm:$0xf]  ;;  %v2476_v23 = vld [vmem:[%s2604_s8 + $0x30] ss:$8 sps:$4 sm:$0xff]   ;;  %v972_v27 = vshll.u32 %v2639_v21, 16  ;;  %v977_v28 = vshrl.u32 %v2108_v22, 16 }
  0x15   : > { %2279 = vmatprep.mubr.msk.bf16.mxu1 %vm297_vm1, %v2475_v17  ;;  %2284 = vmatpush3.bf16.msra.mxu1 %v591_v9  ;;  %v963_v25 = vshrl.u32 %v2106_v20, 16  ;;  %v966_v26 = vshll.u32 %v2106_v20, 16  ;;  %v980_v29 = vshll.u32 %v2108_v22, 16  ;;  %v986_v30 = vshll.u32 %v2644_v24, 16  ;;  %v2110_v33 = vld [vmem:[%s2604_s8 + $0x18] sm:$0xf] }
  0x16   : > { %2439 = vmatprep.subr.msk.bf16.mxu1 %vm356_vm0, %v2080_v8  ;;  %v1202_v31 = vrot.slane %v2639_v21, 5  ;;  %v1206_v32 = vrot.slane %v2644_v24, 5  ;;  %v974_v36 = vrot.slane %v972_v27, 5  ;;  %v979_v37 = vrot.slane %v977_v28, 4  ;;  %v2653_v38 = vld [vmem:[%s2604_s8 + $0x1c] sm:$0x1] }
  0x17   : > { %v965_v34 = vrot.slane %v963_v25, 4  ;;  %v968_v35 = vrot.slane %v966_v26, 5  ;;  %v982_v39 = vrot.slane %v980_v29, 5  ;;  %v988_v40 = vrot.slane %v986_v30, 5  ;;  %v2112_v41 = vld [vmem:[%s2604_s8 + $0x20] sm:$0xf] }
  0x18   : > { %v2657_v42 = vld [vmem:[%s2604_s8 + $0x24] sm:$0x1]  ;;  %v991_v44 = vshrl.u32 %v2110_v33, 16  ;;  %v994_v45 = vshll.u32 %v2110_v33, 16  ;;  %v1000_v46 = vshll.u32 %v2653_v38, 16  ;;  %v1005_v49 = vshrl.u32 %v2112_v41, 16 }
  0x19   : > { %v969_v43 = vor.u32 %v968_v35, %v965_v34  ;;  %v983_v48 = vor.u32 %v982_v39, %v979_v37  ;;  %v1008_v50 = vshll.u32 %v2112_v41, 16  ;;  %v1014_v51 = vshll.u32 %v2657_v42, 16  ;;  %v433_v52 = vld [vmem:[%s2604_s8] sm:$0xf]  ;;  %v2670_v57 = vld [vmem:[%s2604_s8 + $0x4] sm:$0x1] }
  0x1a   : > { %v993_v54 = vrot.slane %v991_v44, 4  ;;  %v996_v55 = vrot.slane %v994_v45, 5  ;;  %v1002_v56 = vrot.slane %v1000_v46, 5  ;;  %v1007_v59 = vrot.slane %v1005_v49, 4  ;;  %v435_v62 = vld [vmem:[%s2604_s8 + $0x8] sm:$0xf] }
  0x1b   : > { %v970_v53 = vrot.slane %v969_v43, 4  ;;  %v984_v58 = vrot.slane %v983_v48, 4  ;;  %v1010_v60 = vrot.slane %v1008_v50, 5  ;;  %v1016_v61 = vrot.slane %v1014_v51, 5  ;;  %v2680_v8 = vld [vmem:[%s2604_s8 + $0xc] sm:$0x1] }
  0x1c   : > { %2280 = vmatmul.mubr.msk.bf16.gmra.mrb[4].mxu1 %vm297_vm1, %v2476_v23  ;;  %v997_v0 = vor.u32 %v996_v55, %v993_v54  ;;  %v1210_v1 = vrot.slane %v2653_v38, 5  ;;  %v1214_v3 = vrot.slane %v2657_v42, 5  ;;  %v453_v9 = vshrl.u32 %v433_v52, 16  ;;  %v437_v23 = vld [vmem:[%s2604_s8 + $0x10] sm:$0xf] }
  0x1d   : > { %v975_v63 = vsel %vm2662_vm4, %v970_v53, %v974_v36  ;;  %v989_v5 = vsel %vm2662_vm4, %v984_v58, %v988_v40  ;;  %v1011_v7 = vor.u32 %v1010_v60, %v1007_v59  ;;  %v456_v15 = vshll.u32 %v433_v52, 16  ;;  %v2685_v29 = vld [vmem:[%s2604_s8 + $0x14] sm:$0x1]  ;;  %v439_v36 = vld [vmem:[%s2604_s8 + $0x18] sm:$0xf] }
  0x1e   : > { %v2123_v16 = vcombine.low %v975_v63, %v989_v5  ;;  %v998_v17 = vrot.slane %v997_v0, 4  ;;  %v462_v20 = vshll.u32 %v2670_v57, 16  ;;  %v467_v22 = vshrl.u32 %v435_v62, 16  ;;  %v2695_v41 = vld [vmem:[%s2604_s8 + $0x1c] sm:$0x1] }
  0x1f   : > { %v1012_v25 = vrot.slane %v1011_v7, 4  ;;  %v455_v26 = vrot.slane %v453_v9, 4  ;;  %v458_v27 = vrot.slane %v456_v15, 5  ;;  %v470_v28 = vshll.u32 %v435_v62, 16  ;;  %v2131_v44 = vld [vmem:[%s2604_s8 + $0x8] sm:$0xe] }
  0x20   : > { %2315 = vmatprep.mubr.msk.bf16.mxu0 %vm297_vm1, %v2123_v16  ;;  %v1003_v30 = vsel %vm2662_vm4, %v998_v17, %v1002_v56  ;;  %v464_v33 = vrot.slane %v462_v20, 5  ;;  %v469_v34 = vrot.slane %v467_v22, 4  ;;  %v476_v35 = vshll.u32 %v2680_v8, 16  ;;  %v2132_v50 = vld [vmem:[%s2604_s8 + $0x10] sm:$0xe] }
  0x21   : > { %v1017_v37 = vsel %vm2662_vm4, %v1012_v25, %v1016_v61  ;;  %v459_v39 = vor.u32 %v458_v27, %v455_v26  ;;  %v472_v40 = vrot.slane %v470_v28, 5  ;;  %v481_v43 = vshrl.u32 %v437_v23, 16  ;;  %v2133_v55 = vld [vmem:[%s2604_s8 + $0x18] sm:$0xe]  ;;  %v2134_v62 = vld [vmem:[%s2604_s8 + $0x20] sm:$0xe] }
  0x22   : > { %v2124_v45 = vcombine.low %v1003_v30, %v1017_v37  ;;  %v478_v46 = vrot.slane %v476_v35, 5  ;;  %v484_v48 = vshll.u32 %v437_v23, 16  ;;  %v490_v49 = vshll.u32 %v2685_v29, 16  ;;  %v441_v20 = vld [vmem:[%s2604_s8 + $0x20] sm:$0xf] }
  0x23   : > { %v460_v51 = vrot.slane %v459_v39, 4  ;;  %v473_v52 = vor.u32 %v472_v40, %v469_v34  ;;  %v483_v53 = vrot.slane %v481_v43, 4  ;;  %v495_v54 = vshrl.u32 %v439_v36, 16  ;;  %v2727_v30 = vld [vmem:[%s2604_s8 + $0x24] sm:$0x1] }
  0x24   : > { %2316 = vmatmul.mubr.msk.bf16.vlgmr.msra.gmra.mrb[0].mxu0 %vm297_vm1, %v2124_v45  ;;  %v486_v56 = vrot.slane %v484_v48, 5  ;;  %v492_v58 = vrot.slane %v490_v49, 5  ;;  %v498_v59 = vshll.u32 %v439_v36, 16  ;;  %v504_v60 = vshll.u32 %v2695_v41, 16  ;;  %v2739_v35 = vld [vmem:[%s2604_s8 + $0x2c] sm:$0x1] }
  0x25   : > { %2324 = vmatpush3.bf16.msra.mxu0 %v2599_v10  ;;  %v465_v63 = vsel %vm2662_vm4, %v460_v51, %v464_v33  ;;  %v474_v0 = vrot.slane %v473_v52, 4  ;;  %v497_v5 = vrot.slane %v495_v54, 4  ;;  %v2139_v7 = vrot.slane %v2131_v44, 9  ;;  %v443_v33 = vld [vmem:[%s2604_s8 + $0x28] sm:$0xf] }
  0x26   : > { %v487_v9 = vor.u32 %v486_v56, %v483_v53  ;;  %v500_v15 = vrot.slane %v498_v59, 5  ;;  %v506_v16 = vrot.slane %v504_v60, 5  ;;  %v2140_v17 = vrot.slane %v2132_v50, 9  ;;  %2444 = vmatprep.subr.msk.bf16.mxu0 %vm356_vm0, %v2582_v6  ;;  %v445_v36 = vld [vmem:[%s2604_s8 + $0x30] sm:$0xf] }
  0x27   : > { %v479_v10 = vsel %vm2662_vm4, %v474_v0, %v478_v46  ;;  %v1203_v22 = vsel %vm2705_vm7, %v2139_v7, %v1202_v31  ;;  %v2141_v23 = vrot.slane %v2133_v55, 9  ;;  %v2142_v25 = vrot.slane %v2134_v62, 9  ;;  %v447_v44 = vld [vmem:[%s2604_s8 + $0x38] sm:$0xf]  ;;  %v2755_v49 = vld [vmem:[%s2604_s8 + $0x3c] sm:$0x1] }
  0x28   : > { %v2064_v26 = vcombine.low %v465_v63, %v479_v10  ;;  %v488_v27 = vrot.slane %v487_v9, 4  ;;  %v501_v28 = vor.u32 %v500_v15, %v497_v5  ;;  %v1207_v6 = vsel %vm2705_vm7, %v2140_v17, %v1206_v32  ;;  %v2758_v55 = vld [vmem:[%s2604_s8 + $0x2c] sm:$0x1]  ;;  %v2135_v56 = vld [vmem:[%s2604_s8 + $0x28] sm:$0xe] }
  0x29   : > { %v2148_v34 = vcombine.low %v1203_v22, %v1207_v6  ;;  %v1211_v21 = vsel %vm2705_vm7, %v2141_v23, %v1210_v1  ;;  %v1215_v31 = vsel %vm2705_vm7, %v2142_v25, %v1214_v3  ;;  %v509_v24 = vshrl.u32 %v441_v20, 16  ;;  %v2746_v1 = vld [vmem:[%s2604_s8 + $0x34] sm:$0x1]  ;;  %v2136_v15 = vld [vmem:[%s2604_s8 + $0x30] sm:$0xe] }
  0x2a   : > { %2285 = vmatprep.mubr.msk.bf16.mxu1 %vm297_vm1, %v2064_v26  ;;  %v493_v32 = vsel %vm2662_vm4, %v488_v27, %v492_v58  ;;  %v502_v38 = vrot.slane %v501_v28, 4  ;;  %v2149_v37 = vcombine.low %v1211_v21, %v1215_v31  ;;  %v512_v39 = vshll.u32 %v441_v20, 16  ;;  %v2762_v63 = vld [vmem:[%s2604_s8 + $0x34] sm:$0x1]  ;;  %v2137_v22 = vld [vmem:[%s2604_s8 + $0x38] sm:$0xe] }
  0x2b   : > { %2325 = vmatprep.mubr.msk.bf16.mxu0 %vm297_vm1, %v2148_v34  ;;  %v511_v42 = vrot.slane %v509_v24, 4  ;;  %v518_v3 = vshll.u32 %v2727_v30, 16  ;;  %v523_v40 = vshrl.u32 %v443_v33, 16  ;;  %v526_v43 = vshll.u32 %v443_v33, 16  ;;  %v2119_v28 = vld [vmem:[%s2604_s8 + $0x3c] sm:$0x1] }
  0x2c   : > { %v507_v45 = vsel %vm2662_vm4, %v502_v38, %v506_v16  ;;  %v514_v46 = vrot.slane %v512_v39, 5  ;;  %v532_v48 = vshll.u32 %v2739_v35, 16  ;;  %v537_v50 = vshrl.u32 %v445_v36, 16  ;;  %v2121_v21 = vld [vmem:[%s2604_s8 + $0x44] sm:$0x1] }
  0x2d   : > { %v2065_v51 = vcombine.low %v493_v32, %v507_v45  ;;  %v520_v52 = vrot.slane %v518_v3, 5  ;;  %v525_v53 = vrot.slane %v523_v40, 4  ;;  %v528_v54 = vrot.slane %v526_v43, 5  ;;  %v2138_v31 = vld [vmem:[%s2604_s8 + $0x40] sm:$0xe] }
  0x2e   : > { %v515_v58 = vor.u32 %v514_v46, %v511_v42  ;;  %v534_v59 = vrot.slane %v532_v48, 5  ;;  %v539_v60 = vrot.slane %v537_v50, 4  ;;  %v540_v62 = vshll.u32 %v445_v36, 16  ;;  %v666_v42 = vld [vmem:[%s2604_s8] sm:$0xe] }
  0x2f   : > { %2286 = vmatmul.mubr.msk.bf16.vlgmr.msra.gmra.mrb[0].mxu1 %vm297_vm1, %v2065_v51  ;;  %v529_v0 = vor.u32 %v528_v54, %v525_v53  ;;  %v546_v5 = vshll.u32 %v2746_v1, 16  ;;  %v551_v7 = vshrl.u32 %v447_v44, 16  ;;  %v554_v9 = vshll.u32 %v447_v44, 16  ;;  %v667_v3 = vld [vmem:[%s2604_s8 + $0x8] sm:$0xe] }
  0x30   : > { %2326 = vmatmul.mubr.msk.bf16.vlgmr.msra.gmra.mrb[0].mxu0 %vm297_vm1, %v2149_v37  ;;  %v516_v16 = vrot.slane %v515_v58, 4  ;;  %2294 = vmatpush3.bf16.msra.mxu1 %v2611_v12  ;;  %v542_v17 = vrot.slane %v540_v62, 5  ;;  %v560_v20 = vshll.u32 %v2755_v49, 16  ;;  %v2143_v10 = vrot.slane %v2135_v56, 9  ;;  %v668_v45 = vld [vmem:[%s2604_s8 + $0x10] sm:$0xe] }
  0x31   : > { %2334 = vmatpush3.bf16.msra.mxu0 %v2608_v11  ;;  %v530_v23 = vrot.slane %v529_v0, 4  ;;  %v548_v25 = vrot.slane %v546_v5, 5  ;;  %v553_v26 = vrot.slane %v551_v7, 4  ;;  %v556_v27 = vrot.slane %v554_v9, 5  ;;  %2440 = vmatprep.subr.msk.bf16.mxu1 %vm356_vm0, %v2621_v14  ;;  %v670_v53 = vld [vmem:[%s2604_s8 + $0x20] sm:$0xe] }
  0x32   : > { %v521_v12 = vsel %vm2662_vm4, %v516_v16, %v520_v52  ;;  %v543_v6 = vor.u32 %v542_v17, %v539_v60  ;;  %v562_v33 = vrot.slane %v560_v20, 5  ;;  %v1218_v34 = vrot.slane %v2758_v55, 5  ;;  %2445 = vmatprep.subr.msk.bf16.mxu0 %vm356_vm0, %v2616_v13  ;;  %v669_v52 = vld [vmem:[%s2604_s8 + $0x18] sm:$0xe]  ;;  %v671_v62 = vld [vmem:[%s2604_s8 + $0x28] sm:$0xe] }
  0x33   : > { %v535_v11 = vsel %vm2662_vm4, %v530_v23, %v534_v59  ;;  %v557_v24 = vor.u32 %v556_v27, %v553_v26  ;;  %v2144_v14 = vrot.slane %v2136_v15, 9  ;;  %v1222_v36 = vrot.slane %v2762_v63, 5  ;;  %v2477_v60 = vld [vmem:[%s2604_s8 + $0x10] ss:$8 sps:$4 sm:$0xff]  }
  0x34   : > { %v2066_v32 = vcombine.low %v521_v12, %v535_v11  ;;  %v544_v38 = vrot.slane %v543_v6, 4  ;;  %v1219_v37 = vsel %vm2705_vm7, %v2143_v10, %v1218_v34  ;;  %v1056_v39 = vshll.u32 %v2119_v28, 16  ;;  %v672_v15 = vld [vmem:[%s2604_s8 + $0x30] sm:$0xe]  ;;  %v673_v27 = vld [vmem:[%s2604_s8 + $0x38] sm:$0xe] }
  0x35   : > { %v558_v40 = vrot.slane %v557_v24, 4  ;;  %v1223_v13 = vsel %vm2705_vm7, %v2144_v14, %v1222_v36  ;;  %v1070_v43 = vshll.u32 %v2121_v21, 16  ;;  %v2145_v44 = vrot.slane %v2137_v22, 9  ;;  %v2478_v24 = vld [vmem:[%s2604_s8 + $0x20] ss:$8 sps:$4 sm:$0xff]  }
  0x36   : > { %2289 = vmatprep.mubr.msk.bf16.mxu1 %vm297_vm1, %v2066_v32  ;;  %v549_v46 = vsel %vm2662_vm4, %v544_v38, %v548_v25  ;;  %v2150_v48 = vcombine.low %v1219_v37, %v1223_v13  ;;  %v2795_v50 = vrot.slane %v1056_v39, 5  ;;  %v1226_v51 = vrot.slane %v2119_v28, 5  ;;  %v2173_v32 = vld [vmem:[%s2604_s8 + $0x10] sm:$0xf]  ;;  %v2840_v39 = vld [vmem:[%s2604_s8 + $0x14] sm:$0x1] }
  0x37   : > { %v563_v54 = vsel %vm2662_vm4, %v558_v40, %v562_v33  ;;  %v2801_v56 = vrot.slane %v1070_v43, 5  ;;  %v2146_v58 = vrot.slane %v2138_v31, 9  ;;  %v1230_v59 = vrot.slane %v2121_v21, 5  ;;  %v2479_v37 = vld [vmem:[%s2604_s8 + $0x30] ss:$8 sps:$4 sm:$0xff]  }
  0x38   : > { %v2067_v0 = vcombine.low %v549_v46, %v563_v54  ;;  %2329 = vmatprep.mubr.msk.bf16.mxu0 %vm297_vm1, %v2150_v48  ;;  %v1227_v5 = vsel %vm2705_vm7, %v2145_v44, %v1226_v51  ;;  %v2072_v7 = vrot.slane %v666_v42, 9  ;;  %v695_v9 = vrot.slane %v2670_v57, 5  ;;  %v2175_v42 = vld [vmem:[%s2604_s8 + $0x18] sm:$0xf]  ;;  %v2177_v44 = vld [vmem:[%s2604_s8 + $0x20] sm:$0xf] }
  0x39   : > { %v1231_v16 = vsel %vm2705_vm7, %v2146_v58, %v1230_v59  ;;  %v2073_v17 = vrot.slane %v667_v3, 9  ;;  %v699_v20 = vrot.slane %v2680_v8, 5  ;;  %v2074_v10 = vrot.slane %v668_v45, 9  ;;  %v2844_v3 = vld [vmem:[%s2604_s8 + $0x1c] sm:$0x1] }
  0x3a   : > { %2290 = vmatmul.mubr.msk.bf16.gmra.mrb[4].mxu1 %vm297_vm1, %v2067_v0  ;;  %v2151_v22 = vcombine.low %v1227_v5, %v1231_v16  ;;  %v696_v23 = vsel %vm2705_vm7, %v2072_v7, %v695_v9  ;;  %v703_v25 = vrot.slane %v2685_v29, 5  ;;  %v2075_v26 = vrot.slane %v669_v52, 9  ;;  %v2214_v51 = vld [vmem:[%s3030_s1 + $0x10] sm:$0x3]  ;;  %v2857_v52 = vld [vmem:[%s2604_s8 + $0x24] sm:$0x1] }
  0x3b   : > { %v700_v57 = vsel %vm2705_vm7, %v2073_v17, %v699_v20  ;;  %v707_v28 = vrot.slane %v2695_v41, 5  ;;  %v2076_v12 = vrot.slane %v670_v53, 9  ;;  %v711_v8 = vrot.slane %v2727_v30, 5  ;;  %v2179_v59 = vld [vmem:[%s2604_s8 + $0x28] sm:$0xf] }
  0x3c   : > { %2330 = vmatmul.mubr.msk.bf16.gmra.mrb[4].mxu0 %vm297_vm1, %v2151_v22  ;;  %v2081_v6 = vcombine.low %v696_v23, %v700_v57  ;;  %v704_v33 = vsel %vm2705_vm7, %v2074_v10, %v703_v25  ;;  %v2077_v29 = vrot.slane %v671_v62, 9  ;;  %v715_v34 = vrot.slane %v2739_v35, 5  ;;  %v2864_v7 = vld [vmem:[%s2604_s8 + $0x2c] sm:$0x1] }
  0x3d   : > { %v708_v21 = vsel %vm2705_vm7, %v2075_v26, %v707_v28  ;;  %2335 = vmatprep.mubr.msk.bf16.mxu0 %vm297_vm1, %v2477_v60  ;;  %v712_v41 = vsel %vm2705_vm7, %v2076_v12, %v711_v8  ;;  %v2078_v30 = vrot.slane %v672_v15, 9  ;;  %v719_v31 = vrot.slane %v2746_v1, 5  ;;  %v2480_v26 = vld [vmem:[%s2604_s8 + $0x40] ss:$8 sps:$4 sm:$0xff]  }
  0x3e   : > { %2295 = vmatprep.mubr.msk.bf16.mxu1 %vm297_vm1, %v2081_v6  ;;  %v2082_v11 = vcombine.low %v704_v33, %v708_v21  ;;  %v716_v35 = vsel %vm2705_vm7, %v2077_v29, %v715_v34  ;;  %v2079_v14 = vrot.slane %v673_v27, 9  ;;  %v723_v36 = vrot.slane %v2755_v49, 5  ;;  %v2481_v27 = vld [vmem:[%s2604_s8 + $0x8] ss:$8 sps:$4 sm:$0xff]  }
  0x3f   : > { %v2083_v38 = vcombine.low %v712_v41, %v716_v35  ;;  %v720_v1 = vsel %vm2705_vm7, %v2078_v30, %v719_v31  ;;  %v1470_v40 = vshrl.u32 %v2173_v32, 16  ;;  %v1473_v13 = vshll.u32 %v2173_v32, 16  ;;  %v2181_v34 = vld [vmem:[%s2604_s8 + $0x30] sm:$0xf]  ;;  %v2885_v31 = vld [vmem:[%s2604_s8 + $0x34] sm:$0x1] }
  0x40   : > { %v1479_v43 = vshll.u32 %v2840_v39, 16  ;;  %v724_v49 = vsel %vm2705_vm7, %v2079_v14, %v723_v36  ;;  %v1484_v45 = vshrl.u32 %v2175_v42, 16  ;;  %v1487_v46 = vshll.u32 %v2175_v42, 16  ;;  %v2890_v14 = vld [vmem:[%s2604_s8 + $0x3c] sm:$0x1] }
  0x41   : > { %v1493_v48 = vshll.u32 %v2844_v3, 16  ;;  %v1472_v53 = vrot.slane %v1470_v40, 4  ;;  %v1475_v54 = vrot.slane %v1473_v13, 5  ;;  %v1498_v60 = vshrl.u32 %v2177_v44, 16  ;;  %v2185_v13 = vld [vmem:[%s2604_s8 + $0x40] sm:$0xf] }
  0x42   : > { %2296 = vmatmul.mubr.msk.bf16.vlgmr.msra.gmra.mrb[0].mxu1 %vm297_vm1, %v2082_v11  ;;  %v1481_v58 = vrot.slane %v1479_v43, 5  ;;  %v1486_v62 = vrot.slane %v1484_v45, 4  ;;  %v1489_v0 = vrot.slane %v1487_v46, 5  ;;  %v1501_v9 = vshll.u32 %v2177_v44, 16  ;;  %v2183_v11 = vld [vmem:[%s2604_s8 + $0x38] sm:$0xf] }
  0x43   : > { %2299 = vmatprep.mubr.msk.bf16.mxu1 %vm297_vm1, %v2083_v38  ;;  %2304 = vmatpush3.bf16.msra.mxu1 %v2634_v19  ;;  %v1495_v5 = vrot.slane %v1493_v48, 5  ;;  %v1476_v15 = vor.u32 %v1475_v54, %v1472_v53  ;;  %v1500_v16 = vrot.slane %v1498_v60, 4  ;;  %v1507_v17 = vshll.u32 %v2857_v52, 16  ;;  %v2900_v46 = vld [vmem:[%s2604_s8 + $0x44] sm:$0x1] }
  0x44   : > { %2336 = vmatmul.mubr.msk.bf16.vlgmr.msra.gmra.mrb[0].mxu0 %vm297_vm1, %v2478_v24  ;;  %v1512_v20 = vshrl.u32 %v2179_v59, 16  ;;  %2442 = vmatprep.subr.msk.bf16.mxu1 %vm356_vm0, %v2561_v2  ;;  %v1490_v19 = vor.u32 %v1489_v0, %v1486_v62  ;;  %v1503_v10 = vrot.slane %v1501_v9, 5  ;;  %v1515_v22 = vshll.u32 %v2179_v59, 16  ;;  %v2187_v53 = vld [vmem:[%s2604_s8 + $0x48] sm:$0xf] }
  0x45   : > { %2344 = vmatpush3.bf16.msra.mxu0 %v2630_v18  ;;  %2339 = vmatprep.mubr.msk.bf16.mxu0 %vm297_vm1, %v2479_v37  ;;  %v1521_v23 = vshll.u32 %v2864_v7, 16  ;;  %v2084_v25 = vcombine.low %v720_v1, %v724_v49  ;;  %v1477_v57 = vrot.slane %v1476_v15, 4  ;;  %v1509_v12 = vrot.slane %v1507_v17, 5  ;;  %v2907_v54 = vld [vmem:[%s2604_s8 + $0x4c] sm:$0x1] }
  0x46   : > { %2446 = vmatprep.subr.msk.bf16.mxu0 %vm356_vm0, %v2214_v51  ;;  %v1514_v28 = vrot.slane %v1512_v20, 4  ;;  %v1491_v2 = vrot.slane %v1490_v19, 4  ;;  %v1504_v18 = vor.u32 %v1503_v10, %v1500_v16  ;;  %v1517_v8 = vrot.slane %v1515_v22, 5  ;;  %v2482_v59 = vld [vmem:[%s2604_s8 + $0x18] ss:$8 sps:$4 sm:$0xff]  }
  0x47   : > { %v1482_v6 = vsel %vm2662_vm4, %v1477_v57, %v1481_v58  ;;  %v1523_v33 = vrot.slane %v1521_v23, 5  ;;  %v2879_v29 = vsel %vm356_vm0, %v2214_v51, 0  ;;  %v1526_v24 = vshrl.u32 %v2181_v34, 16  ;;  %v2114_v9 = vld [vmem:[%s2604_s8 + $0x28] sm:$0xf] }
  0x48   : > { %v1496_v21 = vsel %vm2662_vm4, %v1491_v2, %v1495_v5  ;;  %v1505_v41 = vrot.slane %v1504_v18, 4  ;;  %v1518_v30 = vor.u32 %v1517_v8, %v1514_v28  ;;  %v1529_v36 = vshll.u32 %v2181_v34, 16  ;;  %v2483_v15 = vld [vmem:[%s2604_s8 + $0x28] ss:$8 sps:$4 sm:$0xff]  }
  0x49   : > { %v2190_v35 = vcombine.low %v1482_v6, %v1496_v21  ;;  %v1535_v32 = vshll.u32 %v2885_v31, 16  ;;  %v1540_v38 = vshrl.u32 %v2183_v11, 16  ;;  %v1528_v1 = vrot.slane %v1526_v24, 4  ;;  %v2116_v28 = vld [vmem:[%s2604_s8 + $0x30] sm:$0xf] }
  0x4a   : > { %2300 = vmatmul.mubr.msk.bf16.gmra.mrb[4].mxu1 %vm297_vm1, %v2084_v25  ;;  %v1510_v37 = vsel %vm2662_vm4, %v1505_v41, %v1509_v12  ;;  %v1519_v42 = vrot.slane %v1518_v30, 4  ;;  %v1543_v40 = vshll.u32 %v2183_v11, 16  ;;  %v1531_v43 = vrot.slane %v1529_v36, 5  ;;  %v2118_v30 = vld [vmem:[%s2604_s8 + $0x38] sm:$0xf] }
  0x4b   : > { %2305 = vmatprep.mubr.msk.bf16.mxu1 %vm297_vm1, %v2481_v27  ;;  %v1537_v44 = vrot.slane %v1535_v32, 5  ;;  %v1542_v49 = vrot.slane %v1540_v38, 4  ;;  %v1549_v45 = vshll.u32 %v2890_v14, 16  ;;  %v1554_v58 = vshrl.u32 %v2185_v13, 16 }
  0x4c   : > { %2340 = vmatmul.mubr.msk.bf16.gmra.mrb[4].mxu0 %vm297_vm1, %v2480_v26  ;;  %v1524_v48 = vsel %vm2662_vm4, %v1519_v42, %v1523_v33  ;;  %v1545_v51 = vrot.slane %v1543_v40, 5  ;;  %v1532_v62 = vor.u32 %v1531_v43, %v1528_v1  ;;  %v1557_v5 = vshll.u32 %v2185_v13, 16  ;;  %v2120_v42 = vld [vmem:[%s2604_s8 + $0x40] sm:$0xf] }
  0x4d   : > { %2345 = vmatprep.mubr.msk.bf16.mxu0 %vm297_vm1, %v2190_v35  ;;  %v2191_v60 = vcombine.low %v1510_v37, %v1524_v48  ;;  %v1551_v0 = vrot.slane %v1549_v45, 5  ;;  %v1556_v17 = vrot.slane %v1554_v58, 4  ;;  %v1563_v20 = vshll.u32 %v2900_v46, 16  ;;  %v2484_v1 = vld [vmem:[%s2604_s8 + $0x38] ss:$8 sps:$4 sm:$0xff]  }
  0x4e   : > { %v1546_v16 = vor.u32 %v1545_v51, %v1542_v49  ;;  %v1568_v19 = vshrl.u32 %v2187_v53, 16  ;;  %v1533_v10 = vrot.slane %v1532_v62, 4  ;;  %v1559_v22 = vrot.slane %v1557_v5, 5  ;;  %v2198_v48 = vld [vmem:[%s2604_s8 + $0x10] sm:$0xe] }
  0x4f   : > { %v1571_v23 = vshll.u32 %v2187_v53, 16  ;;  %v1577_v25 = vshll.u32 %v2907_v54, 16  ;;  %v1565_v27 = vrot.slane %v1563_v20, 5  ;;  %v1019_v2 = vshrl.u32 %v2114_v9, 16 }
  0x50   : > { %v1547_v26 = vrot.slane %v1546_v16, 4  ;;  %v1570_v57 = vrot.slane %v1568_v19, 4  ;;  %v1538_v18 = vsel %vm2662_vm4, %v1533_v10, %v1537_v44  ;;  %v1560_v12 = vor.u32 %v1559_v22, %v1556_v17  ;;  %v2201_v19 = vld [vmem:[%s2604_s8 + $0x28] sm:$0xe] }
  0x51   : > { %v1573_v8 = vrot.slane %v1571_v23, 5  ;;  %v1579_v6 = vrot.slane %v1577_v25, 5  ;;  %v1021_v34 = vrot.slane %v1019_v2, 4  ;;  %v1022_v21 = vshll.u32 %v2114_v9, 16  ;;  %v2200_v9 = vld [vmem:[%s2604_s8 + $0x20] sm:$0xe] }
  0x52   : > { %2306 = vmatmul.mubr.msk.bf16.vlgmr.msra.gmra.mrb[0].mxu1 %vm297_vm1, %v2482_v59  ;;  %v1552_v33 = vsel %vm2662_vm4, %v1547_v26, %v1551_v0  ;;  %v1028_v41 = vshll.u32 %v2758_v55, 16  ;;  %v1561_v24 = vrot.slane %v1560_v12, 4  ;;  %v1033_v36 = vshrl.u32 %v2116_v28, 16  ;;  %v2199_v59 = vld [vmem:[%s2604_s8 + $0x18] sm:$0xe] }
  0x53   : > { %2309 = vmatprep.mubr.msk.bf16.mxu1 %vm297_vm1, %v2483_v15  ;;  %2364 = vmatpush3.bf16.msra.mxu1 %v2572_v4  ;;  %v2192_v11 = vcombine.low %v1538_v18, %v1552_v33  ;;  %v1574_v35 = vor.u32 %v1573_v8, %v1570_v57  ;;  %v1024_v4 = vrot.slane %v1022_v21, 5  ;;  %v1036_v38 = vshll.u32 %v2116_v28, 16 }
  0x54   : > { %2346 = vmatmul.mubr.msk.bf16.vlgmr.msra.gmra.mrb[0].mxu0 %vm297_vm1, %v2191_v60  ;;  %v1030_v32 = vrot.slane %v1028_v41, 5  ;;  %v1042_v37 = vshll.u32 %v2762_v63, 16  ;;  %v1566_v55 = vsel %vm2662_vm4, %v1561_v24, %v1565_v27  ;;  %v1035_v13 = vrot.slane %v1033_v36, 4 }
  0x55   : > { %2354 = vmatpush3.bf16.msra.mxu0 %v2879_v29  ;;  %2349 = vmatprep.mubr.msk.bf16.mxu0 %vm297_vm1, %v2192_v11  ;;  %v1575_v40 = vrot.slane %v1574_v35, 4  ;;  %v1047_v43 = vshrl.u32 %v2118_v30, 16  ;;  %v1025_v44 = vor.u32 %v1024_v4, %v1021_v34  ;;  %v1038_v29 = vrot.slane %v1036_v38, 5 }
  0x56   : > { %v1044_v49 = vrot.slane %v1042_v37, 5  ;;  %v1050_v45 = vshll.u32 %v2118_v30, 16  ;;  %v1061_v53 = vshrl.u32 %v2120_v42, 16  ;;  %v1064_v58 = vshll.u32 %v2120_v42, 16  ;;  %v2204_v30 = vld [vmem:[%s2604_s8 + $0x40] sm:$0xe] }
  0x57   : > { %v1580_v63 = vsel %vm2662_vm4, %v1575_v40, %v1579_v6  ;;  %v1049_v51 = vrot.slane %v1047_v43, 4  ;;  %v1026_v62 = vrot.slane %v1025_v44, 4  ;;  %v1039_v0 = vor.u32 %v1038_v29, %v1035_v13  ;;  %v2203_v6 = vld [vmem:[%s2604_s8 + $0x38] sm:$0xe] }
  0x58   : > { %v2193_v60 = vcombine.low %v1566_v55, %v1580_v63  ;;  %v1052_v5 = vrot.slane %v1050_v45, 5  ;;  %v1063_v15 = vrot.slane %v1061_v53, 4  ;;  %v1066_v16 = vrot.slane %v1064_v58, 5  ;;  %v306_v45 = vld [vmem:[#allocation2] sm:$0xff] }
  0x59   : > { %v2206_v17 = vrot.slane %v2198_v48, 9  ;;  %v1709_v20 = vrot.slane %v2840_v39, 5  ;;  %v1031_v10 = vsel %vm2662_vm4, %v1026_v62, %v1030_v32  ;;  %v1040_v22 = vrot.slane %v1039_v0, 4  ;;  %v2202_v39 = vld [vmem:[%s2604_s8 + $0x30] sm:$0xe]  ;;  %v309_v48 = vld [vmem:[#allocation2 + $0x18] sm:$0xff] }
  0x5a   : > { %2310 = vmatmul.mubr.msk.bf16.gmra.mrb[4].mxu1 %vm297_vm1, %v2484_v1  ;;  %v1053_v23 = vor.u32 %v1052_v5, %v1049_v51  ;;  %v2207_v25 = vrot.slane %v2199_v59, 9  ;;  %v1067_v26 = vor.u32 %v1066_v16, %v1063_v15  ;;  %v1713_v57 = vrot.slane %v2844_v3, 5  ;;  %v307_v51 = vld [vmem:[#allocation2 + $0x8] sm:$0xff] }
  0x5b   : > { %v1710_v27 = vsel %vm2705_vm7, %v2206_v17, %v1709_v20  ;;  %v2208_v28 = vrot.slane %v2200_v9, 9  ;;  %v1045_v2 = vsel %vm2662_vm4, %v1040_v22, %v1044_v49  ;;  %v1717_v12 = vrot.slane %v2857_v52, 5  ;;  %v2205_v52 = vld [vmem:[%s2604_s8 + $0x48] sm:$0xe]  ;;  %v308_v49 = vld [vmem:[#allocation2 + $0x10] sm:$0xff]  ;;  %v310_v22 = vld [vmem:[#allocation2 + $0x20] sm:$0xff] }
  0x5c   : > { %2350 = vmatmul.mubr.msk.bf16.gmra.mrb[4].mxu0 %vm297_vm1, %v2193_v60  ;;  %v1054_v18 = vrot.slane %v1053_v23, 4  ;;  %v2209_v8 = vrot.slane %v2201_v19, 9  ;;  %v2125_v33 = vcombine.low %v1031_v10, %v1045_v2  ;;  %v1068_v34 = vrot.slane %v1067_v26, 4  ;;  %v312_v20 = vld [vmem:[#allocation2 + $0x30] sm:$0xff] }
  0x5d   : > { %v1714_v21 = vsel %vm2705_vm7, %v2207_v25, %v1713_v57  ;;  %v1721_v41 = vrot.slane %v2864_v7, 5  ;;  %v1718_v24 = vsel %vm2705_vm7, %v2208_v28, %v1717_v12  ;;  %v2210_v35 = vrot.slane %v2202_v39, 9  ;;  %v313_v25 = vld [vmem:[#allocation2 + $0x38] sm:$0xff]  ;;  %v2223_v28 = vld [vmem:[%s3031_s2] ss:$0 sm:$0xff] }
  0x5e   : > { %v1059_v3 = vsel %vm2662_vm4, %v1054_v18, %v2795_v50  ;;  %v2215_v11 = vcombine.low %v1710_v27, %v1714_v21  ;;  %2319 = vmatprep.mubr.msk.bf16.mxu1 %vm297_vm1, %v2125_v33  ;;  %v1073_v36 = vsel %vm2662_vm4, %v1068_v34, %v2801_v56  ;;  %v1725_v4 = vrot.slane %v2885_v31, 5  ;;  %v311_v27 = vld [vmem:[#allocation2 + $0x28] sm:$0xff] }
  0x5f   : > { %v1722_v7 = vsel %vm2705_vm7, %v2209_v8, %v1721_v41  ;;  %v2211_v32 = vrot.slane %v2203_v6, 9  ;;  %v2126_v38 = vcombine.low %v1059_v3, %v1073_v36  ;;  %v1729_v37 = vrot.slane %v2890_v14, 5  ;;  %v2224_v6 = vld [vmem:[%s3032_s3] ss:$0 sm:$0xff] }
  0x60   : > { %2355 = vmatprep.mubr.msk.bf16.mxu0 %vm297_vm1, %v2215_v11  ;;  %v2216_v50 = vcombine.low %v1718_v24, %v1722_v7  ;;  %v2212_v42 = vrot.slane %v2204_v30, 9  ;;  %v1726_v1 = vsel %vm2705_vm7, %v2210_v35, %v1725_v4  ;;  %v1733_v55 = vrot.slane %v2900_v46, 5 }
  0x61   : > { %v2213_v47 = vrot.slane %v2205_v52, 9  ;;  %v1737_v56 = vrot.slane %v2907_v54, 5  ;;  %v1730_v40 = vsel %vm2705_vm7, %v2211_v32, %v1729_v37 }
  0x62   : > { %v2217_v31 = vcombine.low %v1726_v1, %v1730_v40  ;;  %v1734_v13 = vsel %vm2705_vm7, %v2212_v42, %v1733_v55 }
  0x63   : > { %v1738_v14 = vsel %vm2705_vm7, %v2213_v47, %v1737_v56 }
  0x64   : > { %2356 = vmatmul.mubr.msk.bf16.vlgmr.msra.gmra.mrb[0].mxu0 %vm297_vm1, %v2216_v50  ;;  %v2218_v46 = vcombine.low %v1734_v13, %v1738_v14 }
  0x65   : > { %2359 = vmatprep.mubr.msk.bf16.mxu0 %vm297_vm1, %v2217_v31 }
  0x66   : > { %2320 = vmatmul.mubr.msk.bf16.vlgmr.msra.gmra.mrb[4].mxu1 %vm297_vm1, %v2126_v38 }
  0x6c   : > { %2360 = vmatmul.mubr.msk.bf16.gmra.mrb[4].mxu0 %vm297_vm1, %v2218_v46 }
 0x125   : > { %v2307_v54 = vpop.f32.mrb[0].mxu1 }
 0x126   : > { %v907_v43 = vpop.f32.mrb[1].mxu1  ;;  %v2365_v63 = vadd.f32 %v2307_v54, %v308_v49 }
 0x127   : > { %v2308_v44 = vpop.f32.mrb[2].mxu1  ;;  %v2367_v53 = vadd.f32 %v907_v43, %v306_v45 }
 0x128   : > { %v910_v29 = vpop.f32.mrb[3].mxu1  ;;  %v2369_v61 = vadd.f32 %v2308_v44, %v309_v48 }
 0x129   : > { %v2371_v62 = vadd.f32 %v910_v29, %v307_v51 }
 0x137   : > { %v2357_v58 = vpop.f32.mrb[0].mxu0 }
 0x138   : > { %v2366_v59 = vadd.f32 %v2365_v63, %v2357_v58  ;;  %v1802_v60 = vpop.f32.mrb[1].mxu0 }
 0x139   : > { %v2321_v0 = vpop.f32.mrb[4].mxu1  ;;  %v2368_v5 = vadd.f32 %v2367_v53, %v1802_v60  ;;  %v2358_v9 = vpop.f32.mrb[2].mxu0 }
 0x13a   : > { %v1153_v15 = vpop.f32.mrb[5].mxu1  ;;  %1843 = vst.msk [vmem:[#allocation2 + $0x10] sm:$0xff] %vm297_vm1, %v2366_v59  ;;  %v2370_v16 = vadd.f32 %v2369_v61, %v2358_v9  ;;  %v1805_v17 = vpop.f32.mrb[3].mxu0  ;;  %v2373_v26 = vadd.f32 %v2321_v0, %v312_v20 }
 0x13b   : > { %v2322_v19 = vpop.f32.mrb[6].mxu1  ;;  %1841 = vst.msk [vmem:[#allocation2] sm:$0xff] %vm297_vm1, %v2368_v5  ;;  %v2372_v10 = vadd.f32 %v2371_v62, %v1805_v17  ;;  %v2375_v57 = vadd.f32 %v1153_v15, %v310_v22 }
 0x13c   : > { %v1156_v23 = vpop.f32.mrb[7].mxu1  ;;  %1844 = vst.msk [vmem:[#allocation2 + $0x18] sm:$0xff] %vm297_vm1, %v2370_v16  ;;  %v2377_v2 = vadd.f32 %v2322_v19, %v313_v25 }
 0x13d   : > { %1842 = vst.msk [vmem:[#allocation2 + $0x8] sm:$0xff] %vm297_vm1, %v2372_v10  ;;  %v2379_v33 = vadd.f32 %v1156_v23, %v311_v27 }
 0x13f   : > { %v2361_v39 = vpop.f32.mrb[4].mxu0 }
 0x140   : > { %v2374_v18 = vadd.f32 %v2373_v26, %v2361_v39  ;;  %v1818_v12 = vpop.f32.mrb[5].mxu0 }
 0x141   : > { %v1854_v8 = vld [vmem:[#allocation2 + $0x10] sm:$0xff]  ;;  %v2376_v34 = vadd.f32 %v2375_v57, %v1818_v12  ;;  %v2362_v21 = vpop.f32.mrb[6].mxu0 }
 0x142   : > { %v1869_v41 = vmul.f32 %v2223_v28, %v1854_v8  ;;  %v1852_v30 = vld [vmem:[#allocation2] sm:$0xff]  ;;  %1847 = vst.msk [vmem:[#allocation2 + $0x30] sm:$0xff] %vm297_vm1, %v2374_v18  ;;  %v2378_v3 = vadd.f32 %v2377_v2, %v2362_v21  ;;  %v1821_v11 = vpop.f32.mrb[7].mxu0 }
 0x143   : > { %v1867_v24 = vmul.f32 %v2223_v28, %v1852_v30  ;;  %v1855_v35 = vld [vmem:[#allocation2 + $0x18] sm:$0xff]  ;;  %1845 = vst.msk [vmem:[#allocation2 + $0x20] sm:$0xff] %vm297_vm1, %v2376_v34  ;;  %v2380_v52 = vadd.f32 %v2379_v33, %v1821_v11 }
 0x144   : > { %v1884_v36 = vadd.f32 %v2224_v6, %v1869_v41  ;;  %v1870_v7 = vmul.f32 %v2223_v28, %v1855_v35  ;;  %v1853_v4 = vld [vmem:[#allocation2 + $0x8] sm:$0xff]  ;;  %1848 = vst.msk [vmem:[#allocation2 + $0x38] sm:$0xff] %vm297_vm1, %v2378_v3 }
 0x145   : > { %v1882_v32 = vadd.f32 %v2224_v6, %v1867_v24  ;;  %v1868_v38 = vmul.f32 %v2223_v28, %v1853_v4  ;;  %1846 = vst.msk [vmem:[#allocation2 + $0x28] sm:$0xff] %vm297_vm1, %v2380_v52 }
 0x146   : > { %v1892_v50 = vmax.f32 %v1884_v36, 0.0  ;;  %v1885_v37 = vadd.f32 %v2224_v6, %v1870_v7 }
 0x147   : > { %v1890_v42 = vmax.f32 %v1882_v32, 0.0  ;;  %v1883_v1 = vadd.f32 %v2224_v6, %v1868_v38 }
 0x148   : > { %v1900_v55 = vpack.c.bf16 %v1892_v50, %v1892_v50  ;;  %v1893_v47 = vmax.f32 %v1885_v37, 0.0 }
 0x149   : > { %v1898_v56 = vpack.c.bf16 %v1890_v42, %v1890_v42  ;;  %v1891_v40 = vmax.f32 %v1883_v1, 0.0  ;;  %v1858_v31 = vld [vmem:[#allocation2 + $0x30] sm:$0xff] }
 0x14a   : > { %1909 = vst.msk [vmem:[%s3002_s26 + $0x8] sm:$0xf] %vm1906_vm8, %v1900_v55  ;;  %v1901_v13 = vpack.c.bf16 %v1893_v47, %v1893_v47  ;;  %v1873_v14 = vmul.f32 %v2223_v28, %v1858_v31  ;;  %v1856_v46 = vld [vmem:[#allocation2 + $0x20] sm:$0xff] }
 0x14b   : > { %1907 = vst.msk [vmem:[%s3002_s26] sm:$0xf] %vm1906_vm8, %v1898_v56  ;;  %v1899_v54 = vpack.c.bf16 %v1891_v40, %v1891_v40  ;;  %v1871_v43 = vmul.f32 %v2223_v28, %v1856_v46  ;;  %v1859_v44 = vld [vmem:[#allocation2 + $0x38] sm:$0xff] }
 0x14c   : > { %1910 = vst.msk [vmem:[%s3002_s26 + $0xc] sm:$0xf] %vm1906_vm8, %v1901_v13  ;;  %v1888_v29 = vadd.f32 %v2224_v6, %v1873_v14  ;;  %v1874_v49 = vmul.f32 %v2223_v28, %v1859_v44  ;;  %v1857_v45 = vld [vmem:[#allocation2 + $0x28] sm:$0xff] }
 0x14d   : > { %1908 = vst.msk [vmem:[%s3002_s26 + $0x4] sm:$0xf] %vm1906_vm8, %v1899_v54  ;;  %v1886_v48 = vadd.f32 %v2224_v6, %v1871_v43  ;;  %v1872_v63 = vmul.f32 %v2223_v28, %v1857_v45 }
 0x14e   : > { %v1896_v51 = vmax.f32 %v1888_v29, 0.0  ;;  %v1889_v53 = vadd.f32 %v2224_v6, %v1874_v49 }
 0x14f   : > { %v1894_v58 = vmax.f32 %v1886_v48, 0.0  ;;  %v1887_v61 = vadd.f32 %v2224_v6, %v1872_v63 }
 0x150   : > { %v1904_v59 = vpack.c.bf16 %v1896_v51, %v1896_v51  ;;  %v1897_v60 = vmax.f32 %v1889_v53, 0.0 }
 0x151   : > { %v1902_v62 = vpack.c.bf16 %v1894_v58, %v1894_v58  ;;  %v1895_v0 = vmax.f32 %v1887_v61, 0.0 }
 0x152   : > { %1913 = vst.msk [vmem:[%s3002_s26 + $0x18] sm:$0xf] %vm1906_vm8, %v1904_v59  ;;  %v1905_v5 = vpack.c.bf16 %v1897_v60, %v1897_v60 }
 0x153   : > { %1911 = vst.msk [vmem:[%s3002_s26 + $0x10] sm:$0xf] %vm1906_vm8, %v1902_v62  ;;  %v1903_v9 = vpack.c.bf16 %v1895_v0, %v1895_v0 }
 0x154   : > { %1914 = vst.msk [vmem:[%s3002_s26 + $0x1c] sm:$0xf] %vm1906_vm8, %v1905_v5 }
 0x155   : > { %1912 = vst.msk [vmem:[%s3002_s26 + $0x14] sm:$0xf] %vm1906_vm8, %v1903_v9 }
 0x156 PF: > { %s14_s17 = sadd.s32 1, %s2507_s17   ;;  %s3038_s15 = smov %s2503_s16 }
 0x157   : > { %p11_p5 = scmp.ge.s32.totalorder %s14_s17, 4   ;;  %s3039_s16 = smov %s3041_s18 }
 0x159   :  { %13 = sbr.rel (!%p11_p5) target bundleno = 2 (0x2), region = 93 }

</bundles_post_ra>
